<compile_context>
chip_gen: v7x
topology: tpu7x:2x2x1
jax: 0.10.0
libtpu: 0.0.40
codegen_flags: <defaults>
</compile_context>

<pallas_src>
import functools
import math

import jax
import jax.numpy as jnp
from jax.experimental import pallas as pl
from jax.experimental.pallas import tpu as pltpu


# ------------------------- helpers (valid both inside kernels and in the JAX reference) ----------

def _layer_norm(x, gamma, beta, eps=1e-5):
    # x: (..., D); gamma/beta broadcastable to x
    mean = jnp.mean(x, axis=-1, keepdims=True)
    xc = x - mean
    var = jnp.mean(xc * xc, axis=-1, keepdims=True)
    return xc * jax.lax.rsqrt(var + eps) * gamma + beta


def _gelu_tanh(x):
    # TODO(synk): PyTorch F.gelu defaults to the exact erf form; the tanh approximation is used
    # here (tanh maps to the idle EUP slot). Max abs deviation ~1e-3.
    c = math.sqrt(2.0 / math.pi)
    return 0.5 * x * (1.0 + jnp.tanh(c * (x + 0.044715 * x * x * x)))


# ------------------------------------------ kernels ----------------------------------------------

def _encoder_layer_kernel(
    x_ref, g1_ref, be1_ref,
    wq_ref, bq_ref, wk_ref, bk_ref, wv_ref, bv_ref, wo_ref, bo_ref,
    g2_ref, be2_ref, w1_ref, bf1_ref, w2_ref, bf2_ref,
    o_ref, *, n_heads, scale,
):
    x = x_ref[0]                                                   # (S, D) one batch row

    # --- norm1 + multi-head self-attention (q = k = v = norm1(x)) ---
    xn = _layer_norm(x, g1_ref[...], be1_ref[...])
    attn = jnp.zeros_like(x)
    for h in range(n_heads):                                       # static unroll over heads
        q = jnp.dot(xn, wq_ref[h], preferred_element_type=jnp.float32) + bq_ref[h]   # (S, hd)
        k = jnp.dot(xn, wk_ref[h], preferred_element_type=jnp.float32) + bk_ref[h]
        v = jnp.dot(xn, wv_ref[h], preferred_element_type=jnp.float32) + bv_ref[h]
        s = jnp.dot(q, k.T, preferred_element_type=jnp.float32) * scale              # (S, S)
        s = s - jnp.max(s, axis=-1, keepdims=True)                                    # stable softmax
        p = jnp.exp(s)
        p = p / jnp.sum(p, axis=-1, keepdims=True)
        ctx = jnp.dot(p, v, preferred_element_type=jnp.float32)                       # (S, hd)
        attn = attn + jnp.dot(ctx, wo_ref[h], preferred_element_type=jnp.float32)     # out_proj (per-head slab)
    x = x + attn + bo_ref[...]                                      # residual 1 (dropout = identity)

    # --- norm2 + feed-forward ---
    xn2 = _layer_norm(x, g2_ref[...], be2_ref[...])
    hfc = jnp.dot(xn2, w1_ref[...], preferred_element_type=jnp.float32) + bf1_ref[...]
    hfc = _gelu_tanh(hfc)
    ff = jnp.dot(hfc, w2_ref[...], preferred_element_type=jnp.float32) + bf2_ref[...]
    o_ref[0] = (x + ff).astype(o_ref.dtype)                         # residual 2


def _final_norm_kernel(x_ref, g_ref, b_ref, o_ref):
    o_ref[0] = _layer_norm(x_ref[0], g_ref[...], b_ref[...]).astype(o_ref.dtype)


# ------------------------------------------ wrappers ---------------------------------------------

def _encoder_layer_forward(x, p, n_heads):
    B, S, D = x.shape
    hd = D // n_heads
    dff = p["w1"].shape[1]
    scale = float(hd) ** -0.5

    # head-major weight slabs (wrapper-side parameter plumbing, not kernel work)
    wqh = p["wq"].reshape(D, n_heads, hd).transpose(1, 0, 2)        # (H, D, hd)
    wkh = p["wk"].reshape(D, n_heads, hd).transpose(1, 0, 2)
    wvh = p["wv"].reshape(D, n_heads, hd).transpose(1, 0, 2)
    bqh = p["bq"].reshape(n_heads, 1, hd)
    bkh = p["bk"].reshape(n_heads, 1, hd)
    bvh = p["bv"].reshape(n_heads, 1, hd)
    woh = p["wo"].reshape(n_heads, hd, D)                           # (H, hd, D)
    row = lambda a: a.reshape(1, -1)

    full2 = lambda shape: pl.BlockSpec(shape, lambda i: (0, 0))
    full3 = lambda shape: pl.BlockSpec(shape, lambda i: (0, 0, 0))

    return pl.pallas_call(
        functools.partial(_encoder_layer_kernel, n_heads=n_heads, scale=scale),
        out_shape=jax.ShapeDtypeStruct((B, S, D), x.dtype),
        grid_spec=pltpu.PrefetchScalarGridSpec(
            num_scalar_prefetch=0,
            grid=(B,),
            in_specs=[
                pl.BlockSpec((1, S, D), lambda i: (i, 0, 0)),       # x: one batch row per step
                full2((1, D)), full2((1, D)),                       # norm1 gamma / beta
                full3((n_heads, D, hd)), full3((n_heads, 1, hd)),   # Wq / bq
                full3((n_heads, D, hd)), full3((n_heads, 1, hd)),   # Wk / bk
                full3((n_heads, D, hd)), full3((n_heads, 1, hd)),   # Wv / bv
                full3((n_heads, hd, D)), full2((1, D)),             # Wo / bo
                full2((1, D)), full2((1, D)),                       # norm2 gamma / beta
                full2((D, dff)), full2((1, dff)),                   # fc1 W / b
                full2((dff, D)), full2((1, D)),                     # fc2 W / b
            ],
            out_specs=pl.BlockSpec((1, S, D), lambda i: (i, 0, 0)),
        ),
        compiler_params=pltpu.CompilerParams(dimension_semantics=("parallel",)),
    )(x, row(p["g1"]), row(p["be1"]),
      wqh, bqh, wkh, bkh, wvh, bvh, woh, row(p["bo"]),
      row(p["g2"]), row(p["be2"]), p["w1"], row(p["bf1"]), p["w2"], row(p["bf2"]))


def _final_norm_forward(x, gamma, beta):
    B, S, D = x.shape
    return pl.pallas_call(
        _final_norm_kernel,
        out_shape=jax.ShapeDtypeStruct((B, S, D), x.dtype),
        grid_spec=pltpu.PrefetchScalarGridSpec(
            num_scalar_prefetch=0,
            grid=(B,),
            in_specs=[
                pl.BlockSpec((1, S, D), lambda i: (i, 0, 0)),
                pl.BlockSpec((1, D), lambda i: (0, 0)),
                pl.BlockSpec((1, D), lambda i: (0, 0)),
            ],
            out_specs=pl.BlockSpec((1, S, D), lambda i: (i, 0, 0)),
        ),
        compiler_params=pltpu.CompilerParams(dimension_semantics=("parallel",)),
    )(x, gamma.reshape(1, D), beta.reshape(1, D))


def encoder_forward(x, layer_params, norm_gamma, norm_beta, n_heads,
                    attn_mask=None, output_attention=False):
    """Mirrors Encoder.forward: returns (encoded, attns)."""
    if attn_mask is not None:
        raise NotImplementedError("attn_mask not supported")  # TODO(synk): add additive mask input
    attns = [] if output_attention else None
    for p in layer_params:
        x = _encoder_layer_forward(x, p, n_heads)
        if output_attention:
            attns.append(None)  # TODO(synk): attention weights stay in VMEM, not materialized
    x = _final_norm_forward(x, norm_gamma, norm_beta)
    return x, attns


# ---------------------------------------- parameters ---------------------------------------------

def _init_linear(key, fan_in, fan_out):
    kw, kb = jax.random.split(key)
    bound = 1.0 / math.sqrt(fan_in)
    w = jax.random.uniform(kw, (fan_in, fan_out), jnp.float32, -bound, bound)  # x @ W + b layout
    b = jax.random.uniform(kb, (fan_out,), jnp.float32, -bound, bound)
    return w, b


def init_encoder_params(key, d_model, d_ff, n_layers):
    layers = []
    for _ in range(n_layers):
        keys = jax.random.split(key, 7)
        key = keys[0]
        wq, bq = _init_linear(keys[1], d_model, d_model)
        wk, bk = _init_linear(keys[2], d_model, d_model)
        wv, bv = _init_linear(keys[3], d_model, d_model)
        wo, bo = _init_linear(keys[4], d_model, d_model)
        w1, bf1 = _init_linear(keys[5], d_model, d_ff)
        w2, bf2 = _init_linear(keys[6], d_ff, d_model)
        layers.append(dict(
            g1=jnp.ones((d_model,), jnp.float32), be1=jnp.zeros((d_model,), jnp.float32),
            wq=wq, bq=bq, wk=wk, bk=bk, wv=wv, bv=bv, wo=wo, bo=bo,
            g2=jnp.ones((d_model,), jnp.float32), be2=jnp.zeros((d_model,), jnp.float32),
            w1=w1, bf1=bf1, w2=w2, bf2=bf2))
    norm_gamma = jnp.ones((d_model,), jnp.float32)
    norm_beta = jnp.zeros((d_model,), jnp.float32)
    return layers, norm_gamma, norm_beta


# ---------------------------------------- JAX reference ------------------------------------------

def _ref_encoder(x, layer_params, norm_gamma, norm_beta, n_heads):
    B, S, D = x.shape
    hd = D // n_heads
    scale = float(hd) ** -0.5
    for p in layer_params:
        xn = _layer_norm(x, p["g1"].reshape(1, 1, D), p["be1"].reshape(1, 1, D))
        q = (xn @ p["wq"] + p["bq"]).reshape(B, S, n_heads, hd).transpose(0, 2, 1, 3)
        k = (xn @ p["wk"] + p["bk"]).reshape(B, S, n_heads, hd).transpose(0, 2, 1, 3)
        v = (xn @ p["wv"] + p["bv"]).reshape(B, S, n_heads, hd).transpose(0, 2, 1, 3)
        s = jnp.einsum("bhld,bhsd->bhls", q, k) * scale
        a = jax.nn.softmax(s, axis=-1)
        ctx = jnp.einsum("bhls,bhsd->bhld", a, v).transpose(0, 2, 1, 3).reshape(B, S, D)
        x = x + ctx @ p["wo"] + p["bo"]
        xn2 = _layer_norm(x, p["g2"].reshape(1, 1, D), p["be2"].reshape(1, 1, D))
        x = x + _gelu_tanh(xn2 @ p["w1"] + p["bf1"]) @ p["w2"] + p["bf2"]
    return _layer_norm(x, norm_gamma.reshape(1, 1, D), norm_beta.reshape(1, 1, D))


# -------------------------------------------- main -----------------------------------------------

if __name__ == "__main__":
    batch, seq_len, d_model, d_ff, n_heads, n_layers = 2, 8, 32, 64, 4, 2

    key = jax.random.PRNGKey(0)
    key, kx, kp = jax.random.split(key, 3)
    x = jax.random.normal(kx, (batch, seq_len, d_model), dtype=jnp.float32)
    layers, ng, nb = init_encoder_params(kp, d_model, d_ff, n_layers)

    out, _ = encoder_forward(x, layers, ng, nb, n_heads)
    out = jax.block_until_ready(out)

    ref = _ref_encoder(x, layers, ng, nb, n_heads)
    assert out.shape == (batch, seq_len, d_model)
    assert jnp.allclose(out, ref, atol=5e-3, rtol=5e-3)

    print("KERNEL_OK")
</pallas_src>

<mosaic_0001>
module attributes {stable_mosaic.version = 11 : i64} {
  func.func @_encoder_layer_kernel(%arg0: i32, %arg1: memref<1x8x32xf32, #tpu.memory_space<vmem>>, %arg2: memref<1x32xf32, #tpu.memory_space<vmem>>, %arg3: memref<1x32xf32, #tpu.memory_space<vmem>>, %arg4: memref<4x32x8xf32, #tpu.memory_space<vmem>>, %arg5: memref<4x1x8xf32, #tpu.memory_space<vmem>>, %arg6: memref<4x32x8xf32, #tpu.memory_space<vmem>>, %arg7: memref<4x1x8xf32, #tpu.memory_space<vmem>>, %arg8: memref<4x32x8xf32, #tpu.memory_space<vmem>>, %arg9: memref<4x1x8xf32, #tpu.memory_space<vmem>>, %arg10: memref<4x8x32xf32, #tpu.memory_space<vmem>>, %arg11: memref<1x32xf32, #tpu.memory_space<vmem>>, %arg12: memref<1x32xf32, #tpu.memory_space<vmem>>, %arg13: memref<1x32xf32, #tpu.memory_space<vmem>>, %arg14: memref<32x64xf32, #tpu.memory_space<vmem>>, %arg15: memref<1x64xf32, #tpu.memory_space<vmem>>, %arg16: memref<64x32xf32, #tpu.memory_space<vmem>>, %arg17: memref<1x32xf32, #tpu.memory_space<vmem>>, %arg18: memref<1x8x32xf32, #tpu.memory_space<vmem>>) attributes {dimension_semantics = [#tpu.dimension_semantics<parallel>], iteration_bounds = array<i64: 2>, scalar_prefetch = 0 : i64, scratch_operands = 0 : i64, tpu.core_type = #tpu.core_type<tc>, window_params = [{transform_indices = @transform_0, window_bounds = array<i64: 1, 8, 32>}, {pipeline_mode = #tpu.pipeline_mode<synchronous>, transform_indices = @transform_1, window_bounds = array<i64: 1, 32>}, {pipeline_mode = #tpu.pipeline_mode<synchronous>, transform_indices = @transform_2, window_bounds = array<i64: 1, 32>}, {pipeline_mode = #tpu.pipeline_mode<synchronous>, transform_indices = @transform_3, window_bounds = array<i64: 4, 32, 8>}, {pipeline_mode = #tpu.pipeline_mode<synchronous>, transform_indices = @transform_4, window_bounds = array<i64: 4, 1, 8>}, {pipeline_mode = #tpu.pipeline_mode<synchronous>, transform_indices = @transform_5, window_bounds = array<i64: 4, 32, 8>}, {pipeline_mode = #tpu.pipeline_mode<synchronous>, transform_indices = @transform_6, window_bounds = array<i64: 4, 1, 8>}, {pipeline_mode = #tpu.pipeline_mode<synchronous>, transform_indices = @transform_7, window_bounds = array<i64: 4, 32, 8>}, {pipeline_mode = #tpu.pipeline_mode<synchronous>, transform_indices = @transform_8, window_bounds = array<i64: 4, 1, 8>}, {pipeline_mode = #tpu.pipeline_mode<synchronous>, transform_indices = @transform_9, window_bounds = array<i64: 4, 8, 32>}, {pipeline_mode = #tpu.pipeline_mode<synchronous>, transform_indices = @transform_10, window_bounds = array<i64: 1, 32>}, {pipeline_mode = #tpu.pipeline_mode<synchronous>, transform_indices = @transform_11, window_bounds = array<i64: 1, 32>}, {pipeline_mode = #tpu.pipeline_mode<synchronous>, transform_indices = @transform_12, window_bounds = array<i64: 1, 32>}, {pipeline_mode = #tpu.pipeline_mode<synchronous>, transform_indices = @transform_13, window_bounds = array<i64: 32, 64>}, {pipeline_mode = #tpu.pipeline_mode<synchronous>, transform_indices = @transform_14, window_bounds = array<i64: 1, 64>}, {pipeline_mode = #tpu.pipeline_mode<synchronous>, transform_indices = @transform_15, window_bounds = array<i64: 64, 32>}, {pipeline_mode = #tpu.pipeline_mode<synchronous>, transform_indices = @transform_16, window_bounds = array<i64: 1, 32>}, {transform_indices = @transform_17, window_bounds = array<i64: 1, 8, 32>}]} {
    %c0 = arith.constant 0 : index
    %c0_0 = arith.constant 0 : index
    %c0_1 = arith.constant 0 : index
    %0 = vector.load %arg1[%c0, %c0_0, %c0_1] : memref<1x8x32xf32, #tpu.memory_space<vmem>>, vector<1x8x32xf32>
    %1 = vector.shape_cast %0 : vector<1x8x32xf32> to vector<8x32xf32>
    %c0_2 = arith.constant 0 : index
    %c0_3 = arith.constant 0 : index
    %2 = vector.load %arg2[%c0_2, %c0_3] : memref<1x32xf32, #tpu.memory_space<vmem>>, vector<1x32xf32>
    %c0_4 = arith.constant 0 : index
    %c0_5 = arith.constant 0 : index
    %3 = vector.load %arg3[%c0_4, %c0_5] : memref<1x32xf32, #tpu.memory_space<vmem>>, vector<1x32xf32>
    %cst = arith.constant dense<0.000000e+00> : vector<8xf32>
    %4 = vector.multi_reduction <add>, %1, %cst [1] : vector<8x32xf32> to vector<8xf32>
    %5 = vector.shape_cast %4 : vector<8xf32> to vector<8x1xf32>
    %cst_6 = arith.constant 3.200000e+01 : f32
    %6 = vector.broadcast %cst_6 : f32 to vector<8x1xf32>
    %7 = arith.divf %5, %6 : vector<8x1xf32>
    %8 = vector.broadcast %7 : vector<8x1xf32> to vector<8x32xf32>
    %9 = arith.subf %1, %8 : vector<8x32xf32>
    %10 = arith.mulf %9, %9 : vector<8x32xf32>
    %cst_7 = arith.constant dense<0.000000e+00> : vector<8xf32>
    %11 = vector.multi_reduction <add>, %10, %cst_7 [1] : vector<8x32xf32> to vector<8xf32>
    %12 = vector.shape_cast %11 : vector<8xf32> to vector<8x1xf32>
    %cst_8 = arith.constant 3.200000e+01 : f32
    %13 = vector.broadcast %cst_8 : f32 to vector<8x1xf32>
    %14 = arith.divf %12, %13 : vector<8x1xf32>
    %cst_9 = arith.constant 9.99999974E-6 : f32
    %15 = vector.broadcast %cst_9 : f32 to vector<8x1xf32>
    %16 = arith.addf %14, %15 : vector<8x1xf32>
    %17 = math.rsqrt %16 : vector<8x1xf32>
    %18 = vector.broadcast %17 : vector<8x1xf32> to vector<8x32xf32>
    %19 = arith.mulf %9, %18 : vector<8x32xf32>
    %20 = vector.broadcast %2 : vector<1x32xf32> to vector<8x32xf32>
    %21 = arith.mulf %19, %20 : vector<8x32xf32>
    %22 = vector.broadcast %3 : vector<1x32xf32> to vector<8x32xf32>
    %23 = arith.addf %21, %22 : vector<8x32xf32>
    %cst_10 = arith.constant 0.000000e+00 : f32
    %24 = vector.broadcast %cst_10 : f32 to vector<8x32xf32>
    %c0_11 = arith.constant 0 : index
    %c0_12 = arith.constant 0 : index
    %c0_13 = arith.constant 0 : index
    %25 = vector.load %arg4[%c0_11, %c0_12, %c0_13] : memref<4x32x8xf32, #tpu.memory_space<vmem>>, vector<1x32x8xf32>
    %26 = vector.shape_cast %25 : vector<1x32x8xf32> to vector<32x8xf32>
    %cst_14 = arith.constant dense<0.000000e+00> : vector<8x8xf32>
    %27 = tpu.matmul %23, %26, %cst_14 {dimension_numbers = #tpu.dot_dimension_numbers<[1], [0], [0], [1], [0, 0, 1, 1], [], []>} : vector<8x32xf32>, vector<32x8xf32>, vector<8x8xf32> -> vector<8x8xf32>
    %c0_15 = arith.constant 0 : index
    %c0_16 = arith.constant 0 : index
    %c0_17 = arith.constant 0 : index
    %28 = vector.load %arg5[%c0_15, %c0_16, %c0_17] : memref<4x1x8xf32, #tpu.memory_space<vmem>>, vector<1x1x8xf32>
    %29 = vector.shape_cast %28 : vector<1x1x8xf32> to vector<1x8xf32>
    %30 = vector.broadcast %29 : vector<1x8xf32> to vector<8x8xf32>
    %31 = arith.addf %27, %30 : vector<8x8xf32>
    %c0_18 = arith.constant 0 : index
    %c0_19 = arith.constant 0 : index
    %c0_20 = arith.constant 0 : index
    %32 = vector.load %arg6[%c0_18, %c0_19, %c0_20] : memref<4x32x8xf32, #tpu.memory_space<vmem>>, vector<1x32x8xf32>
    %33 = vector.shape_cast %32 : vector<1x32x8xf32> to vector<32x8xf32>
    %cst_21 = arith.constant dense<0.000000e+00> : vector<8x8xf32>
    %34 = tpu.matmul %23, %33, %cst_21 {dimension_numbers = #tpu.dot_dimension_numbers<[1], [0], [0], [1], [0, 0, 1, 1], [], []>} : vector<8x32xf32>, vector<32x8xf32>, vector<8x8xf32> -> vector<8x8xf32>
    %c0_22 = arith.constant 0 : index
    %c0_23 = arith.constant 0 : index
    %c0_24 = arith.constant 0 : index
    %35 = vector.load %arg7[%c0_22, %c0_23, %c0_24] : memref<4x1x8xf32, #tpu.memory_space<vmem>>, vector<1x1x8xf32>
    %36 = vector.shape_cast %35 : vector<1x1x8xf32> to vector<1x8xf32>
    %37 = vector.broadcast %36 : vector<1x8xf32> to vector<8x8xf32>
    %38 = arith.addf %34, %37 : vector<8x8xf32>
    %c0_25 = arith.constant 0 : index
    %c0_26 = arith.constant 0 : index
    %c0_27 = arith.constant 0 : index
    %39 = vector.load %arg8[%c0_25, %c0_26, %c0_27] : memref<4x32x8xf32, #tpu.memory_space<vmem>>, vector<1x32x8xf32>
    %40 = vector.shape_cast %39 : vector<1x32x8xf32> to vector<32x8xf32>
    %cst_28 = arith.constant dense<0.000000e+00> : vector<8x8xf32>
    %41 = tpu.matmul %23, %40, %cst_28 {dimension_numbers = #tpu.dot_dimension_numbers<[1], [0], [0], [1], [0, 0, 1, 1], [], []>} : vector<8x32xf32>, vector<32x8xf32>, vector<8x8xf32> -> vector<8x8xf32>
    %c0_29 = arith.constant 0 : index
    %c0_30 = arith.constant 0 : index
    %c0_31 = arith.constant 0 : index
    %42 = vector.load %arg9[%c0_29, %c0_30, %c0_31] : memref<4x1x8xf32, #tpu.memory_space<vmem>>, vector<1x1x8xf32>
    %43 = vector.shape_cast %42 : vector<1x1x8xf32> to vector<1x8xf32>
    %44 = vector.broadcast %43 : vector<1x8xf32> to vector<8x8xf32>
    %45 = arith.addf %41, %44 : vector<8x8xf32>
    %46 = tpu.transpose %38, [1, 0] : vector<8x8xf32> -> vector<8x8xf32>
    %cst_32 = arith.constant dense<0.000000e+00> : vector<8x8xf32>
    %47 = tpu.matmul %31, %46, %cst_32 {dimension_numbers = #tpu.dot_dimension_numbers<[1], [0], [0], [1], [0, 0, 1, 1], [], []>} : vector<8x8xf32>, vector<8x8xf32>, vector<8x8xf32> -> vector<8x8xf32>
    %cst_33 = arith.constant 0.353553385 : f32
    %48 = vector.broadcast %cst_33 : f32 to vector<8x8xf32>
    %49 = arith.mulf %47, %48 : vector<8x8xf32>
    %cst_34 = arith.constant dense<0xFF800000> : vector<8xf32>
    %50 = vector.multi_reduction <maximumf>, %49, %cst_34 [1] : vector<8x8xf32> to vector<8xf32>
    %51 = vector.shape_cast %50 : vector<8xf32> to vector<8x1xf32>
    %52 = vector.broadcast %51 : vector<8x1xf32> to vector<8x8xf32>
    %53 = arith.subf %49, %52 : vector<8x8xf32>
    %54 = math.exp %53 : vector<8x8xf32>
    %cst_35 = arith.constant dense<0.000000e+00> : vector<8xf32>
    %55 = vector.multi_reduction <add>, %54, %cst_35 [1] : vector<8x8xf32> to vector<8xf32>
    %56 = vector.shape_cast %55 : vector<8xf32> to vector<8x1xf32>
    %57 = vector.broadcast %56 : vector<8x1xf32> to vector<8x8xf32>
    %58 = arith.divf %54, %57 : vector<8x8xf32>
    %cst_36 = arith.constant dense<0.000000e+00> : vector<8x8xf32>
    %59 = tpu.matmul %58, %45, %cst_36 {dimension_numbers = #tpu.dot_dimension_numbers<[1], [0], [0], [1], [0, 0, 1, 1], [], []>} : vector<8x8xf32>, vector<8x8xf32>, vector<8x8xf32> -> vector<8x8xf32>
    %c0_37 = arith.constant 0 : index
    %c0_38 = arith.constant 0 : index
    %c0_39 = arith.constant 0 : index
    %60 = vector.load %arg10[%c0_37, %c0_38, %c0_39] : memref<4x8x32xf32, #tpu.memory_space<vmem>>, vector<1x8x32xf32>
    %61 = vector.shape_cast %60 : vector<1x8x32xf32> to vector<8x32xf32>
    %cst_40 = arith.constant dense<0.000000e+00> : vector<8x32xf32>
    %62 = tpu.matmul %59, %61, %cst_40 {dimension_numbers = #tpu.dot_dimension_numbers<[1], [0], [0], [1], [0, 0, 1, 1], [], []>} : vector<8x8xf32>, vector<8x32xf32>, vector<8x32xf32> -> vector<8x32xf32>
    %63 = arith.addf %24, %62 : vector<8x32xf32>
    %c1 = arith.constant 1 : index
    %c0_41 = arith.constant 0 : index
    %c0_42 = arith.constant 0 : index
    %64 = vector.load %arg4[%c1, %c0_41, %c0_42] : memref<4x32x8xf32, #tpu.memory_space<vmem>>, vector<1x32x8xf32>
    %65 = vector.shape_cast %64 : vector<1x32x8xf32> to vector<32x8xf32>
    %cst_43 = arith.constant dense<0.000000e+00> : vector<8x8xf32>
    %66 = tpu.matmul %23, %65, %cst_43 {dimension_numbers = #tpu.dot_dimension_numbers<[1], [0], [0], [1], [0, 0, 1, 1], [], []>} : vector<8x32xf32>, vector<32x8xf32>, vector<8x8xf32> -> vector<8x8xf32>
    %c1_44 = arith.constant 1 : index
    %c0_45 = arith.constant 0 : index
    %c0_46 = arith.constant 0 : index
    %67 = vector.load %arg5[%c1_44, %c0_45, %c0_46] : memref<4x1x8xf32, #tpu.memory_space<vmem>>, vector<1x1x8xf32>
    %68 = vector.shape_cast %67 : vector<1x1x8xf32> to vector<1x8xf32>
    %69 = vector.broadcast %68 : vector<1x8xf32> to vector<8x8xf32>
    %70 = arith.addf %66, %69 : vector<8x8xf32>
    %c1_47 = arith.constant 1 : index
    %c0_48 = arith.constant 0 : index
    %c0_49 = arith.constant 0 : index
    %71 = vector.load %arg6[%c1_47, %c0_48, %c0_49] : memref<4x32x8xf32, #tpu.memory_space<vmem>>, vector<1x32x8xf32>
    %72 = vector.shape_cast %71 : vector<1x32x8xf32> to vector<32x8xf32>
    %cst_50 = arith.constant dense<0.000000e+00> : vector<8x8xf32>
    %73 = tpu.matmul %23, %72, %cst_50 {dimension_numbers = #tpu.dot_dimension_numbers<[1], [0], [0], [1], [0, 0, 1, 1], [], []>} : vector<8x32xf32>, vector<32x8xf32>, vector<8x8xf32> -> vector<8x8xf32>
    %c1_51 = arith.constant 1 : index
    %c0_52 = arith.constant 0 : index
    %c0_53 = arith.constant 0 : index
    %74 = vector.load %arg7[%c1_51, %c0_52, %c0_53] : memref<4x1x8xf32, #tpu.memory_space<vmem>>, vector<1x1x8xf32>
    %75 = vector.shape_cast %74 : vector<1x1x8xf32> to vector<1x8xf32>
    %76 = vector.broadcast %75 : vector<1x8xf32> to vector<8x8xf32>
    %77 = arith.addf %73, %76 : vector<8x8xf32>
    %c1_54 = arith.constant 1 : index
    %c0_55 = arith.constant 0 : index
    %c0_56 = arith.constant 0 : index
    %78 = vector.load %arg8[%c1_54, %c0_55, %c0_56] : memref<4x32x8xf32, #tpu.memory_space<vmem>>, vector<1x32x8xf32>
    %79 = vector.shape_cast %78 : vector<1x32x8xf32> to vector<32x8xf32>
    %cst_57 = arith.constant dense<0.000000e+00> : vector<8x8xf32>
    %80 = tpu.matmul %23, %79, %cst_57 {dimension_numbers = #tpu.dot_dimension_numbers<[1], [0], [0], [1], [0, 0, 1, 1], [], []>} : vector<8x32xf32>, vector<32x8xf32>, vector<8x8xf32> -> vector<8x8xf32>
    %c1_58 = arith.constant 1 : index
    %c0_59 = arith.constant 0 : index
    %c0_60 = arith.constant 0 : index
    %81 = vector.load %arg9[%c1_58, %c0_59, %c0_60] : memref<4x1x8xf32, #tpu.memory_space<vmem>>, vector<1x1x8xf32>
    %82 = vector.shape_cast %81 : vector<1x1x8xf32> to vector<1x8xf32>
    %83 = vector.broadcast %82 : vector<1x8xf32> to vector<8x8xf32>
    %84 = arith.addf %80, %83 : vector<8x8xf32>
    %85 = tpu.transpose %77, [1, 0] : vector<8x8xf32> -> vector<8x8xf32>
    %cst_61 = arith.constant dense<0.000000e+00> : vector<8x8xf32>
    %86 = tpu.matmul %70, %85, %cst_61 {dimension_numbers = #tpu.dot_dimension_numbers<[1], [0], [0], [1], [0, 0, 1, 1], [], []>} : vector<8x8xf32>, vector<8x8xf32>, vector<8x8xf32> -> vector<8x8xf32>
    %cst_62 = arith.constant 0.353553385 : f32
    %87 = vector.broadcast %cst_62 : f32 to vector<8x8xf32>
    %88 = arith.mulf %86, %87 : vector<8x8xf32>
    %cst_63 = arith.constant dense<0xFF800000> : vector<8xf32>
    %89 = vector.multi_reduction <maximumf>, %88, %cst_63 [1] : vector<8x8xf32> to vector<8xf32>
    %90 = vector.shape_cast %89 : vector<8xf32> to vector<8x1xf32>
    %91 = vector.broadcast %90 : vector<8x1xf32> to vector<8x8xf32>
    %92 = arith.subf %88, %91 : vector<8x8xf32>
    %93 = math.exp %92 : vector<8x8xf32>
    %cst_64 = arith.constant dense<0.000000e+00> : vector<8xf32>
    %94 = vector.multi_reduction <add>, %93, %cst_64 [1] : vector<8x8xf32> to vector<8xf32>
    %95 = vector.shape_cast %94 : vector<8xf32> to vector<8x1xf32>
    %96 = vector.broadcast %95 : vector<8x1xf32> to vector<8x8xf32>
    %97 = arith.divf %93, %96 : vector<8x8xf32>
    %cst_65 = arith.constant dense<0.000000e+00> : vector<8x8xf32>
    %98 = tpu.matmul %97, %84, %cst_65 {dimension_numbers = #tpu.dot_dimension_numbers<[1], [0], [0], [1], [0, 0, 1, 1], [], []>} : vector<8x8xf32>, vector<8x8xf32>, vector<8x8xf32> -> vector<8x8xf32>
    %c1_66 = arith.constant 1 : index
    %c0_67 = arith.constant 0 : index
    %c0_68 = arith.constant 0 : index
    %99 = vector.load %arg10[%c1_66, %c0_67, %c0_68] : memref<4x8x32xf32, #tpu.memory_space<vmem>>, vector<1x8x32xf32>
    %100 = vector.shape_cast %99 : vector<1x8x32xf32> to vector<8x32xf32>
    %cst_69 = arith.constant dense<0.000000e+00> : vector<8x32xf32>
    %101 = tpu.matmul %98, %100, %cst_69 {dimension_numbers = #tpu.dot_dimension_numbers<[1], [0], [0], [1], [0, 0, 1, 1], [], []>} : vector<8x8xf32>, vector<8x32xf32>, vector<8x32xf32> -> vector<8x32xf32>
    %102 = arith.addf %63, %101 : vector<8x32xf32>
    %c2 = arith.constant 2 : index
    %c0_70 = arith.constant 0 : index
    %c0_71 = arith.constant 0 : index
    %103 = vector.load %arg4[%c2, %c0_70, %c0_71] : memref<4x32x8xf32, #tpu.memory_space<vmem>>, vector<1x32x8xf32>
    %104 = vector.shape_cast %103 : vector<1x32x8xf32> to vector<32x8xf32>
    %cst_72 = arith.constant dense<0.000000e+00> : vector<8x8xf32>
    %105 = tpu.matmul %23, %104, %cst_72 {dimension_numbers = #tpu.dot_dimension_numbers<[1], [0], [0], [1], [0, 0, 1, 1], [], []>} : vector<8x32xf32>, vector<32x8xf32>, vector<8x8xf32> -> vector<8x8xf32>
    %c2_73 = arith.constant 2 : index
    %c0_74 = arith.constant 0 : index
    %c0_75 = arith.constant 0 : index
    %106 = vector.load %arg5[%c2_73, %c0_74, %c0_75] : memref<4x1x8xf32, #tpu.memory_space<vmem>>, vector<1x1x8xf32>
    %107 = vector.shape_cast %106 : vector<1x1x8xf32> to vector<1x8xf32>
    %108 = vector.broadcast %107 : vector<1x8xf32> to vector<8x8xf32>
    %109 = arith.addf %105, %108 : vector<8x8xf32>
    %c2_76 = arith.constant 2 : index
    %c0_77 = arith.constant 0 : index
    %c0_78 = arith.constant 0 : index
    %110 = vector.load %arg6[%c2_76, %c0_77, %c0_78] : memref<4x32x8xf32, #tpu.memory_space<vmem>>, vector<1x32x8xf32>
    %111 = vector.shape_cast %110 : vector<1x32x8xf32> to vector<32x8xf32>
    %cst_79 = arith.constant dense<0.000000e+00> : vector<8x8xf32>
    %112 = tpu.matmul %23, %111, %cst_79 {dimension_numbers = #tpu.dot_dimension_numbers<[1], [0], [0], [1], [0, 0, 1, 1], [], []>} : vector<8x32xf32>, vector<32x8xf32>, vector<8x8xf32> -> vector<8x8xf32>
    %c2_80 = arith.constant 2 : index
    %c0_81 = arith.constant 0 : index
    %c0_82 = arith.constant 0 : index
    %113 = vector.load %arg7[%c2_80, %c0_81, %c0_82] : memref<4x1x8xf32, #tpu.memory_space<vmem>>, vector<1x1x8xf32>
    %114 = vector.shape_cast %113 : vector<1x1x8xf32> to vector<1x8xf32>
    %115 = vector.broadcast %114 : vector<1x8xf32> to vector<8x8xf32>
    %116 = arith.addf %112, %115 : vector<8x8xf32>
    %c2_83 = arith.constant 2 : index
    %c0_84 = arith.constant 0 : index
    %c0_85 = arith.constant 0 : index
    %117 = vector.load %arg8[%c2_83, %c0_84, %c0_85] : memref<4x32x8xf32, #tpu.memory_space<vmem>>, vector<1x32x8xf32>
    %118 = vector.shape_cast %117 : vector<1x32x8xf32> to vector<32x8xf32>
    %cst_86 = arith.constant dense<0.000000e+00> : vector<8x8xf32>
    %119 = tpu.matmul %23, %118, %cst_86 {dimension_numbers = #tpu.dot_dimension_numbers<[1], [0], [0], [1], [0, 0, 1, 1], [], []>} : vector<8x32xf32>, vector<32x8xf32>, vector<8x8xf32> -> vector<8x8xf32>
    %c2_87 = arith.constant 2 : index
    %c0_88 = arith.constant 0 : index
    %c0_89 = arith.constant 0 : index
    %120 = vector.load %arg9[%c2_87, %c0_88, %c0_89] : memref<4x1x8xf32, #tpu.memory_space<vmem>>, vector<1x1x8xf32>
    %121 = vector.shape_cast %120 : vector<1x1x8xf32> to vector<1x8xf32>
    %122 = vector.broadcast %121 : vector<1x8xf32> to vector<8x8xf32>
    %123 = arith.addf %119, %122 : vector<8x8xf32>
    %124 = tpu.transpose %116, [1, 0] : vector<8x8xf32> -> vector<8x8xf32>
    %cst_90 = arith.constant dense<0.000000e+00> : vector<8x8xf32>
    %125 = tpu.matmul %109, %124, %cst_90 {dimension_numbers = #tpu.dot_dimension_numbers<[1], [0], [0], [1], [0, 0, 1, 1], [], []>} : vector<8x8xf32>, vector<8x8xf32>, vector<8x8xf32> -> vector<8x8xf32>
    %cst_91 = arith.constant 0.353553385 : f32
    %126 = vector.broadcast %cst_91 : f32 to vector<8x8xf32>
    %127 = arith.mulf %125, %126 : vector<8x8xf32>
    %cst_92 = arith.constant dense<0xFF800000> : vector<8xf32>
    %128 = vector.multi_reduction <maximumf>, %127, %cst_92 [1] : vector<8x8xf32> to vector<8xf32>
    %129 = vector.shape_cast %128 : vector<8xf32> to vector<8x1xf32>
    %130 = vector.broadcast %129 : vector<8x1xf32> to vector<8x8xf32>
    %131 = arith.subf %127, %130 : vector<8x8xf32>
    %132 = math.exp %131 : vector<8x8xf32>
    %cst_93 = arith.constant dense<0.000000e+00> : vector<8xf32>
    %133 = vector.multi_reduction <add>, %132, %cst_93 [1] : vector<8x8xf32> to vector<8xf32>
    %134 = vector.shape_cast %133 : vector<8xf32> to vector<8x1xf32>
    %135 = vector.broadcast %134 : vector<8x1xf32> to vector<8x8xf32>
    %136 = arith.divf %132, %135 : vector<8x8xf32>
    %cst_94 = arith.constant dense<0.000000e+00> : vector<8x8xf32>
    %137 = tpu.matmul %136, %123, %cst_94 {dimension_numbers = #tpu.dot_dimension_numbers<[1], [0], [0], [1], [0, 0, 1, 1], [], []>} : vector<8x8xf32>, vector<8x8xf32>, vector<8x8xf32> -> vector<8x8xf32>
    %c2_95 = arith.constant 2 : index
    %c0_96 = arith.constant 0 : index
    %c0_97 = arith.constant 0 : index
    %138 = vector.load %arg10[%c2_95, %c0_96, %c0_97] : memref<4x8x32xf32, #tpu.memory_space<vmem>>, vector<1x8x32xf32>
    %139 = vector.shape_cast %138 : vector<1x8x32xf32> to vector<8x32xf32>
    %cst_98 = arith.constant dense<0.000000e+00> : vector<8x32xf32>
    %140 = tpu.matmul %137, %139, %cst_98 {dimension_numbers = #tpu.dot_dimension_numbers<[1], [0], [0], [1], [0, 0, 1, 1], [], []>} : vector<8x8xf32>, vector<8x32xf32>, vector<8x32xf32> -> vector<8x32xf32>
    %141 = arith.addf %102, %140 : vector<8x32xf32>
    %c3 = arith.constant 3 : index
    %c0_99 = arith.constant 0 : index
    %c0_100 = arith.constant 0 : index
    %142 = vector.load %arg4[%c3, %c0_99, %c0_100] : memref<4x32x8xf32, #tpu.memory_space<vmem>>, vector<1x32x8xf32>
    %143 = vector.shape_cast %142 : vector<1x32x8xf32> to vector<32x8xf32>
    %cst_101 = arith.constant dense<0.000000e+00> : vector<8x8xf32>
    %144 = tpu.matmul %23, %143, %cst_101 {dimension_numbers = #tpu.dot_dimension_numbers<[1], [0], [0], [1], [0, 0, 1, 1], [], []>} : vector<8x32xf32>, vector<32x8xf32>, vector<8x8xf32> -> vector<8x8xf32>
    %c3_102 = arith.constant 3 : index
    %c0_103 = arith.constant 0 : index
    %c0_104 = arith.constant 0 : index
    %145 = vector.load %arg5[%c3_102, %c0_103, %c0_104] : memref<4x1x8xf32, #tpu.memory_space<vmem>>, vector<1x1x8xf32>
    %146 = vector.shape_cast %145 : vector<1x1x8xf32> to vector<1x8xf32>
    %147 = vector.broadcast %146 : vector<1x8xf32> to vector<8x8xf32>
    %148 = arith.addf %144, %147 : vector<8x8xf32>
    %c3_105 = arith.constant 3 : index
    %c0_106 = arith.constant 0 : index
    %c0_107 = arith.constant 0 : index
    %149 = vector.load %arg6[%c3_105, %c0_106, %c0_107] : memref<4x32x8xf32, #tpu.memory_space<vmem>>, vector<1x32x8xf32>
    %150 = vector.shape_cast %149 : vector<1x32x8xf32> to vector<32x8xf32>
    %cst_108 = arith.constant dense<0.000000e+00> : vector<8x8xf32>
    %151 = tpu.matmul %23, %150, %cst_108 {dimension_numbers = #tpu.dot_dimension_numbers<[1], [0], [0], [1], [0, 0, 1, 1], [], []>} : vector<8x32xf32>, vector<32x8xf32>, vector<8x8xf32> -> vector<8x8xf32>
    %c3_109 = arith.constant 3 : index
    %c0_110 = arith.constant 0 : index
    %c0_111 = arith.constant 0 : index
    %152 = vector.load %arg7[%c3_109, %c0_110, %c0_111] : memref<4x1x8xf32, #tpu.memory_space<vmem>>, vector<1x1x8xf32>
    %153 = vector.shape_cast %152 : vector<1x1x8xf32> to vector<1x8xf32>
    %154 = vector.broadcast %153 : vector<1x8xf32> to vector<8x8xf32>
    %155 = arith.addf %151, %154 : vector<8x8xf32>
    %c3_112 = arith.constant 3 : index
    %c0_113 = arith.constant 0 : index
    %c0_114 = arith.constant 0 : index
    %156 = vector.load %arg8[%c3_112, %c0_113, %c0_114] : memref<4x32x8xf32, #tpu.memory_space<vmem>>, vector<1x32x8xf32>
    %157 = vector.shape_cast %156 : vector<1x32x8xf32> to vector<32x8xf32>
    %cst_115 = arith.constant dense<0.000000e+00> : vector<8x8xf32>
    %158 = tpu.matmul %23, %157, %cst_115 {dimension_numbers = #tpu.dot_dimension_numbers<[1], [0], [0], [1], [0, 0, 1, 1], [], []>} : vector<8x32xf32>, vector<32x8xf32>, vector<8x8xf32> -> vector<8x8xf32>
    %c3_116 = arith.constant 3 : index
    %c0_117 = arith.constant 0 : index
    %c0_118 = arith.constant 0 : index
    %159 = vector.load %arg9[%c3_116, %c0_117, %c0_118] : memref<4x1x8xf32, #tpu.memory_space<vmem>>, vector<1x1x8xf32>
    %160 = vector.shape_cast %159 : vector<1x1x8xf32> to vector<1x8xf32>
    %161 = vector.broadcast %160 : vector<1x8xf32> to vector<8x8xf32>
    %162 = arith.addf %158, %161 : vector<8x8xf32>
    %163 = tpu.transpose %155, [1, 0] : vector<8x8xf32> -> vector<8x8xf32>
    %cst_119 = arith.constant dense<0.000000e+00> : vector<8x8xf32>
    %164 = tpu.matmul %148, %163, %cst_119 {dimension_numbers = #tpu.dot_dimension_numbers<[1], [0], [0], [1], [0, 0, 1, 1], [], []>} : vector<8x8xf32>, vector<8x8xf32>, vector<8x8xf32> -> vector<8x8xf32>
    %cst_120 = arith.constant 0.353553385 : f32
    %165 = vector.broadcast %cst_120 : f32 to vector<8x8xf32>
    %166 = arith.mulf %164, %165 : vector<8x8xf32>
    %cst_121 = arith.constant dense<0xFF800000> : vector<8xf32>
    %167 = vector.multi_reduction <maximumf>, %166, %cst_121 [1] : vector<8x8xf32> to vector<8xf32>
    %168 = vector.shape_cast %167 : vector<8xf32> to vector<8x1xf32>
    %169 = vector.broadcast %168 : vector<8x1xf32> to vector<8x8xf32>
    %170 = arith.subf %166, %169 : vector<8x8xf32>
    %171 = math.exp %170 : vector<8x8xf32>
    %cst_122 = arith.constant dense<0.000000e+00> : vector<8xf32>
    %172 = vector.multi_reduction <add>, %171, %cst_122 [1] : vector<8x8xf32> to vector<8xf32>
    %173 = vector.shape_cast %172 : vector<8xf32> to vector<8x1xf32>
    %174 = vector.broadcast %173 : vector<8x1xf32> to vector<8x8xf32>
    %175 = arith.divf %171, %174 : vector<8x8xf32>
    %cst_123 = arith.constant dense<0.000000e+00> : vector<8x8xf32>
    %176 = tpu.matmul %175, %162, %cst_123 {dimension_numbers = #tpu.dot_dimension_numbers<[1], [0], [0], [1], [0, 0, 1, 1], [], []>} : vector<8x8xf32>, vector<8x8xf32>, vector<8x8xf32> -> vector<8x8xf32>
    %c3_124 = arith.constant 3 : index
    %c0_125 = arith.constant 0 : index
    %c0_126 = arith.constant 0 : index
    %177 = vector.load %arg10[%c3_124, %c0_125, %c0_126] : memref<4x8x32xf32, #tpu.memory_space<vmem>>, vector<1x8x32xf32>
    %178 = vector.shape_cast %177 : vector<1x8x32xf32> to vector<8x32xf32>
    %cst_127 = arith.constant dense<0.000000e+00> : vector<8x32xf32>
    %179 = tpu.matmul %176, %178, %cst_127 {dimension_numbers = #tpu.dot_dimension_numbers<[1], [0], [0], [1], [0, 0, 1, 1], [], []>} : vector<8x8xf32>, vector<8x32xf32>, vector<8x32xf32> -> vector<8x32xf32>
    %180 = arith.addf %141, %179 : vector<8x32xf32>
    %181 = arith.addf %1, %180 : vector<8x32xf32>
    %c0_128 = arith.constant 0 : index
    %c0_129 = arith.constant 0 : index
    %182 = vector.load %arg11[%c0_128, %c0_129] : memref<1x32xf32, #tpu.memory_space<vmem>>, vector<1x32xf32>
    %183 = vector.broadcast %182 : vector<1x32xf32> to vector<8x32xf32>
    %184 = arith.addf %181, %183 : vector<8x32xf32>
    %c0_130 = arith.constant 0 : index
    %c0_131 = arith.constant 0 : index
    %185 = vector.load %arg12[%c0_130, %c0_131] : memref<1x32xf32, #tpu.memory_space<vmem>>, vector<1x32xf32>
    %c0_132 = arith.constant 0 : index
    %c0_133 = arith.constant 0 : index
    %186 = vector.load %arg13[%c0_132, %c0_133] : memref<1x32xf32, #tpu.memory_space<vmem>>, vector<1x32xf32>
    %cst_134 = arith.constant dense<0.000000e+00> : vector<8xf32>
    %187 = vector.multi_reduction <add>, %184, %cst_134 [1] : vector<8x32xf32> to vector<8xf32>
    %188 = vector.shape_cast %187 : vector<8xf32> to vector<8x1xf32>
    %cst_135 = arith.constant 3.200000e+01 : f32
    %189 = vector.broadcast %cst_135 : f32 to vector<8x1xf32>
    %190 = arith.divf %188, %189 : vector<8x1xf32>
    %191 = vector.broadcast %190 : vector<8x1xf32> to vector<8x32xf32>
    %192 = arith.subf %184, %191 : vector<8x32xf32>
    %193 = arith.mulf %192, %192 : vector<8x32xf32>
    %cst_136 = arith.constant dense<0.000000e+00> : vector<8xf32>
    %194 = vector.multi_reduction <add>, %193, %cst_136 [1] : vector<8x32xf32> to vector<8xf32>
    %195 = vector.shape_cast %194 : vector<8xf32> to vector<8x1xf32>
    %cst_137 = arith.constant 3.200000e+01 : f32
    %196 = vector.broadcast %cst_137 : f32 to vector<8x1xf32>
    %197 = arith.divf %195, %196 : vector<8x1xf32>
    %cst_138 = arith.constant 9.99999974E-6 : f32
    %198 = vector.broadcast %cst_138 : f32 to vector<8x1xf32>
    %199 = arith.addf %197, %198 : vector<8x1xf32>
    %200 = math.rsqrt %199 : vector<8x1xf32>
    %201 = vector.broadcast %200 : vector<8x1xf32> to vector<8x32xf32>
    %202 = arith.mulf %192, %201 : vector<8x32xf32>
    %203 = vector.broadcast %185 : vector<1x32xf32> to vector<8x32xf32>
    %204 = arith.mulf %202, %203 : vector<8x32xf32>
    %205 = vector.broadcast %186 : vector<1x32xf32> to vector<8x32xf32>
    %206 = arith.addf %204, %205 : vector<8x32xf32>
    %c0_139 = arith.constant 0 : index
    %c0_140 = arith.constant 0 : index
    %207 = vector.load %arg14[%c0_139, %c0_140] : memref<32x64xf32, #tpu.memory_space<vmem>>, vector<32x64xf32>
    %cst_141 = arith.constant dense<0.000000e+00> : vector<8x64xf32>
    %208 = tpu.matmul %206, %207, %cst_141 {dimension_numbers = #tpu.dot_dimension_numbers<[1], [0], [0], [1], [0, 0, 1, 1], [], []>} : vector<8x32xf32>, vector<32x64xf32>, vector<8x64xf32> -> vector<8x64xf32>
    %c0_142 = arith.constant 0 : index
    %c0_143 = arith.constant 0 : index
    %209 = vector.load %arg15[%c0_142, %c0_143] : memref<1x64xf32, #tpu.memory_space<vmem>>, vector<1x64xf32>
    %210 = vector.broadcast %209 : vector<1x64xf32> to vector<8x64xf32>
    %211 = arith.addf %208, %210 : vector<8x64xf32>
    %cst_144 = arith.constant 5.000000e-01 : f32
    %212 = vector.broadcast %cst_144 : f32 to vector<8x64xf32>
    %213 = arith.mulf %212, %211 : vector<8x64xf32>
    %cst_145 = arith.constant 4.471500e-02 : f32
    %214 = vector.broadcast %cst_145 : f32 to vector<8x64xf32>
    %215 = arith.mulf %214, %211 : vector<8x64xf32>
    %216 = arith.mulf %215, %211 : vector<8x64xf32>
    %217 = arith.mulf %216, %211 : vector<8x64xf32>
    %218 = arith.addf %211, %217 : vector<8x64xf32>
    %cst_146 = arith.constant 0.797884583 : f32
    %219 = vector.broadcast %cst_146 : f32 to vector<8x64xf32>
    %220 = arith.mulf %219, %218 : vector<8x64xf32>
    %221 = math.tanh %220 : vector<8x64xf32>
    %cst_147 = arith.constant 1.000000e+00 : f32
    %222 = vector.broadcast %cst_147 : f32 to vector<8x64xf32>
    %223 = arith.addf %222, %221 : vector<8x64xf32>
    %224 = arith.mulf %213, %223 : vector<8x64xf32>
    %c0_148 = arith.constant 0 : index
    %c0_149 = arith.constant 0 : index
    %225 = vector.load %arg16[%c0_148, %c0_149] : memref<64x32xf32, #tpu.memory_space<vmem>>, vector<64x32xf32>
    %cst_150 = arith.constant dense<0.000000e+00> : vector<8x32xf32>
    %226 = tpu.matmul %224, %225, %cst_150 {dimension_numbers = #tpu.dot_dimension_numbers<[1], [0], [0], [1], [0, 0, 1, 1], [], []>} : vector<8x64xf32>, vector<64x32xf32>, vector<8x32xf32> -> vector<8x32xf32>
    %c0_151 = arith.constant 0 : index
    %c0_152 = arith.constant 0 : index
    %227 = vector.load %arg17[%c0_151, %c0_152] : memref<1x32xf32, #tpu.memory_space<vmem>>, vector<1x32xf32>
    %228 = vector.broadcast %227 : vector<1x32xf32> to vector<8x32xf32>
    %229 = arith.addf %226, %228 : vector<8x32xf32>
    %230 = arith.addf %184, %229 : vector<8x32xf32>
    %c0_153 = arith.constant 0 : index
    %c0_154 = arith.constant 0 : index
    %c0_155 = arith.constant 0 : index
    %231 = vector.load %arg18[%c0_153, %c0_154, %c0_155] : memref<1x8x32xf32, #tpu.memory_space<vmem>>, vector<1x8x32xf32>
    %232 = vector.shape_cast %231 : vector<1x8x32xf32> to vector<8x32xf32>
    %233 = vector.shape_cast %230 : vector<8x32xf32> to vector<1x8x32xf32>
    tpu.vector_store %arg18[%c0_153, %c0_154, %c0_155], %233 {strides = array<i32>} : memref<1x8x32xf32, #tpu.memory_space<vmem>>, vector<1x8x32xf32>,
    return
  }
  func.func @transform_0(%arg0: i32) -> (i32, i32, i32) {
    %c0_i32 = arith.constant 0 : i32
    %c0_i32_0 = arith.constant 0 : i32
    %c0_i32_1 = arith.constant 0 : i32
    return %arg0, %c0_i32, %c0_i32_0 : i32, i32, i32
  }
  func.func @transform_1(%arg0: i32) -> (i32, i32) {
    %c0_i32 = arith.constant 0 : i32
    %c0_i32_0 = arith.constant 0 : i32
    %c0_i32_1 = arith.constant 0 : i32
    return %c0_i32, %c0_i32_0 : i32, i32
  }
  func.func @transform_2(%arg0: i32) -> (i32, i32) {
    %c0_i32 = arith.constant 0 : i32
    %c0_i32_0 = arith.constant 0 : i32
    %c0_i32_1 = arith.constant 0 : i32
    return %c0_i32, %c0_i32_0 : i32, i32
  }
  func.func @transform_3(%arg0: i32) -> (i32, i32, i32) {
    %c0_i32 = arith.constant 0 : i32
    %c0_i32_0 = arith.constant 0 : i32
    %c0_i32_1 = arith.constant 0 : i32
    %c0_i32_2 = arith.constant 0 : i32
    return %c0_i32, %c0_i32_0, %c0_i32_1 : i32, i32, i32
  }
  func.func @transform_4(%arg0: i32) -> (i32, i32, i32) {
    %c0_i32 = arith.constant 0 : i32
    %c0_i32_0 = arith.constant 0 : i32
    %c0_i32_1 = arith.constant 0 : i32
    %c0_i32_2 = arith.constant 0 : i32
    return %c0_i32, %c0_i32_0, %c0_i32_1 : i32, i32, i32
  }
  func.func @transform_5(%arg0: i32) -> (i32, i32, i32) {
    %c0_i32 = arith.constant 0 : i32
    %c0_i32_0 = arith.constant 0 : i32
    %c0_i32_1 = arith.constant 0 : i32
    %c0_i32_2 = arith.constant 0 : i32
    return %c0_i32, %c0_i32_0, %c0_i32_1 : i32, i32, i32
  }
  func.func @transform_6(%arg0: i32) -> (i32, i32, i32) {
    %c0_i32 = arith.constant 0 : i32
    %c0_i32_0 = arith.constant 0 : i32
    %c0_i32_1 = arith.constant 0 : i32
    %c0_i32_2 = arith.constant 0 : i32
    return %c0_i32, %c0_i32_0, %c0_i32_1 : i32, i32, i32
  }
  func.func @transform_7(%arg0: i32) -> (i32, i32, i32) {
    %c0_i32 = arith.constant 0 : i32
    %c0_i32_0 = arith.constant 0 : i32
    %c0_i32_1 = arith.constant 0 : i32
    %c0_i32_2 = arith.constant 0 : i32
    return %c0_i32, %c0_i32_0, %c0_i32_1 : i32, i32, i32
  }
  func.func @transform_8(%arg0: i32) -> (i32, i32, i32) {
    %c0_i32 = arith.constant 0 : i32
    %c0_i32_0 = arith.constant 0 : i32
    %c0_i32_1 = arith.constant 0 : i32
    %c0_i32_2 = arith.constant 0 : i32
    return %c0_i32, %c0_i32_0, %c0_i32_1 : i32, i32, i32
  }
  func.func @transform_9(%arg0: i32) -> (i32, i32, i32) {
    %c0_i32 = arith.constant 0 : i32
    %c0_i32_0 = arith.constant 0 : i32
    %c0_i32_1 = arith.constant 0 : i32
    %c0_i32_2 = arith.constant 0 : i32
    return %c0_i32, %c0_i32_0, %c0_i32_1 : i32, i32, i32
  }
  func.func @transform_10(%arg0: i32) -> (i32, i32) {
    %c0_i32 = arith.constant 0 : i32
    %c0_i32_0 = arith.constant 0 : i32
    %c0_i32_1 = arith.constant 0 : i32
    return %c0_i32, %c0_i32_0 : i32, i32
  }
  func.func @transform_11(%arg0: i32) -> (i32, i32) {
    %c0_i32 = arith.constant 0 : i32
    %c0_i32_0 = arith.constant 0 : i32
    %c0_i32_1 = arith.constant 0 : i32
    return %c0_i32, %c0_i32_0 : i32, i32
  }
  func.func @transform_12(%arg0: i32) -> (i32, i32) {
    %c0_i32 = arith.constant 0 : i32
    %c0_i32_0 = arith.constant 0 : i32
    %c0_i32_1 = arith.constant 0 : i32
    return %c0_i32, %c0_i32_0 : i32, i32
  }
  func.func @transform_13(%arg0: i32) -> (i32, i32) {
    %c0_i32 = arith.constant 0 : i32
    %c0_i32_0 = arith.constant 0 : i32
    %c0_i32_1 = arith.constant 0 : i32
    return %c0_i32, %c0_i32_0 : i32, i32
  }
  func.func @transform_14(%arg0: i32) -> (i32, i32) {
    %c0_i32 = arith.constant 0 : i32
    %c0_i32_0 = arith.constant 0 : i32
    %c0_i32_1 = arith.constant 0 : i32
    return %c0_i32, %c0_i32_0 : i32, i32
  }
  func.func @transform_15(%arg0: i32) -> (i32, i32) {
    %c0_i32 = arith.constant 0 : i32
    %c0_i32_0 = arith.constant 0 : i32
    %c0_i32_1 = arith.constant 0 : i32
    return %c0_i32, %c0_i32_0 : i32, i32
  }
  func.func @transform_16(%arg0: i32) -> (i32, i32) {
    %c0_i32 = arith.constant 0 : i32
    %c0_i32_0 = arith.constant 0 : i32
    %c0_i32_1 = arith.constant 0 : i32
    return %c0_i32, %c0_i32_0 : i32, i32
  }
  func.func @transform_17(%arg0: i32) -> (i32, i32, i32) {
    %c0_i32 = arith.constant 0 : i32
    %c0_i32_0 = arith.constant 0 : i32
    %c0_i32_1 = arith.constant 0 : i32
    return %arg0, %c0_i32, %c0_i32_0 : i32, i32, i32
  }
}

</mosaic_0001>

<bundles_post_ra>
// kernel: tpu_custom_call.1
= control target key start
LH: loop header
LB: loop body
LE: loop exit
PB: predicated region body
PF: predicated region fallthrough
CT: control target
= control target key end

     0   :  { %s4061_s0 = inlined_call_operand.vmem [shape: f32[2,8,32], index: 0, kind: input, shape index: {}]   ;;  %s4062_s1 = inlined_call_operand.vmem [shape: f32[1,32], index: 1, kind: input, shape index: {}]   ;;  %s4063_s2 = inlined_call_operand.vmem [shape: f32[1,32], index: 2, kind: input, shape index: {}]   ;;  %s4064_s3 = inlined_call_operand.vmem [shape: f32[4,32,8], index: 3, kind: input, shape index: {}]   ;;  %s4065_s4 = inlined_call_operand.vmem [shape: f32[4,1,8], index: 4, kind: input, shape index: {}]   ;;  %s4066_s5 = inlined_call_operand.vmem [shape: f32[4,32,8], index: 5, kind: input, shape index: {}]   ;;  %s4067_s6 = inlined_call_operand.vmem [shape: f32[4,1,8], index: 6, kind: input, shape index: {}]   ;;  %s4068_s7 = inlined_call_operand.vmem [shape: f32[4,32,8], index: 7, kind: input, shape index: {}]   ;;  %s4069_s8 = inlined_call_operand.vmem [shape: f32[4,1,8], index: 8, kind: input, shape index: {}]   ;;  %s4070_s9 = inlined_call_operand.vmem [shape: f32[4,8,32], index: 9, kind: input, shape index: {}]   ;;  %s4071_s10 = inlined_call_operand.vmem [shape: f32[1,32], index: 10, kind: input, shape index: {}]   ;;  %s4072_s11 = inlined_call_operand.vmem [shape: f32[1,32], index: 11, kind: input, shape index: {}]   ;;  %s4073_s12 = inlined_call_operand.vmem [shape: f32[1,32], index: 12, kind: input, shape index: {}]   ;;  %s4074_s13 = inlined_call_operand.vmem [shape: f32[32,64], index: 13, kind: input, shape index: {}]   ;;  %s4075_s14 = inlined_call_operand.vmem [shape: f32[1,64], index: 14, kind: input, shape index: {}]   ;;  %s4076_s15 = inlined_call_operand.vmem [shape: f32[64,32], index: 15, kind: input, shape index: {}]   ;;  %s4077_s16 = inlined_call_operand.vmem [shape: f32[1,32], index: 16, kind: input, shape index: {}]   ;;  %s4078_s17 = inlined_call_operand.hbm [shape: f32[2,8,32], index: 17, kind: output, shape index: {}]  }
   0x1   :  { %4083 = sst [smem:[#allocation9_spill]] %s4061_s0 }
   0x2   :  { %4084 = sst [smem:[#allocation10_spill]] %s4062_s1 }
   0x3   :  { %4085 = sst [smem:[#allocation11_spill]] %s4063_s2 }
   0x4   :  { %22 = vsyncpa [#allocation3], 0 }
   0x5   :  { %24 = vsyncpa [#allocation3 + $0x1], 0  ;;  %s3549_s24 = smov 0   ;;  %s3551_s25 = smov 0  }
   0x6   :  { %s3553_s26 = smov 0   ;;  %s3555_s27 = smov 0  }
   0x7 LB: > { %4086 = sst [smem:[#allocation5_spill]] %s3449_s26  ;;  %s3570_s28 = sadd.s32 4294967295, %s3453_s27   ;;  %s3453_s27 = sphi %s3555_s27, %s4096_s27   ;;  %s3449_s26 = sphi %s3553_s26, %s4098_s26   ;;  %s3445_s25 = sphi %s3551_s25, %s4100_s25   ;;  %s3441_s24 = sphi %s3549_s24, %s4099_s24  }
   0x8   : > { %s2810_s29 = sadd.s32 4294967294, %s3453_s27   ;;  %s3574_s0 = sadd.s32 1, %s3453_s27  }
   0x9   : > { %4087 = sst [smem:[#allocation6_spill]] %s3574_s0  ;;  %s399_s30 = sadd.s32 1, %s3449_s26 }
   0xa   : > { %s396_s18 = ssub.s32 %s3453_s27, %s3574_s0  ;;  %p409_p0 = scmp.ne.s32.totalorder %s3449_s26, %s3445_s25 }
   0xb   : > { %p397_p1 = scmp.eq.s32.totalorder %s396_s18, 0  ;;  %p410_p2 = scmp.eq.s32.totalorder %s3570_s28, 1 }
   0xc   : > { %p415_p3 = scmp.ne.s32.totalorder %s3445_s25, %s3441_s24  ;;  %p416_p4 = scmp.eq.s32.totalorder %s2810_s29, 1 }
   0xd   : > { %s3585_s19 = scalar_select %p397_p1, %s3449_s26, %s399_s30  }
   0xe   : > { %p3587_p5 = por %p410_p2, %p409_p0  ;;  %p3591_p6 = por %p416_p4, %p415_p3 }
   0xf   : > { %4088 = sst [smem:[#allocation7_spill]] %s3585_s19  ;;  %p2813_p7 = scmp.ge.s32.totalorder %s3453_s27, 1 }
  0x10   : > { %s4090_s20 = scalar_select %p3591_p6, 1, 0 }
  0x11   : > { %p489_p8 = scmp.lt.s32.totalorder %s3453_s27, 3 }
  0x12   : > { %4091 = sst [smem:[#allocation8_spill]] %s4090_s20 }
  0x13   : > { %p490_p9 = pnand %p2813_p7, %p489_p8 }
  0x14   : > { %p540_p10 = scmp.lt.s32.totalorder (!%p490_p9), %s3570_s28, 1  ;;  %vm547_vm0 = vcmask (!%p490_p9), 261120   ;;  %s4092_s30 = sld [smem:[#allocation9_spill]] (!%p490_p9)  ;;  %v576_v7 = vld [vmem:[%s4064_s3] sm:$0xff] (!%p490_p9)  ;;  %v577_v8 = vld [vmem:[%s4064_s3 + $0x8] sm:$0xff] (!%p490_p9)  ;;  %v3455_v12 = vmov (!%p490_p9), 0.0|0.0  }
  0x15   : > { %493 = sbr.rel (%p490_p9) target bundleno = 4983 (0x1377), region = 88  ;;  %v3238_v9 = vpack.c.bf16 (!%p490_p9), %v577_v8, %v576_v7  ;;  %v660_v10 = vld [vmem:[%s4066_s5] sm:$0xff] (!%p490_p9)  ;;  %v661_v11 = vld [vmem:[%s4066_s5 + $0x8] sm:$0xff] (!%p490_p9)  ;;  %3237 = vmatprep.subr.bf16.mxu0 (!%p490_p9), %v3455_v12  ;;  %3243 = vmatprep.subr.bf16.mxu1 (!%p490_p9), %v3455_v12  ;;  %v578_v14 = vld [vmem:[%s4064_s3 + $0x10] sm:$0xff] (!%p490_p9)  ;;  %vm3456_vm1 = vmmov (!%p490_p9), 0   ;;  %v3457_v20 = vmov (!%p490_p9), 0.0  }
  0x16   : > { %v3244_v13 = vpack.c.bf16 (!%p490_p9), %v661_v11, %v660_v10  ;;  %v579_v15 = vld [vmem:[%s4064_s3 + $0x18] sm:$0xff] (!%p490_p9)  ;;  %v662_v17 = vld [vmem:[%s4066_s5 + $0x10] sm:$0xff] (!%p490_p9)  ;;  %3023 = vmatprep.mubr.msk.f32.mxu0 (!%p490_p9), %vm3456_vm1, %v3457_v20  ;;  %3034 = vmatprep.mubr.msk.f32.mxu1 (!%p490_p9), %vm3456_vm1, %v3457_v20  ;;  %s4093_s23 = sld [smem:[#allocation10_spill]] (!%p490_p9)  ;;  %v741_v27 = vld [vmem:[%s4068_s7] sm:$0xff] (!%p490_p9)  ;;  %s4094_s2 = sld [smem:[#allocation11_spill]] (!%p490_p9)  ;;  %vm822_vm2 = vcmask (!%p490_p9), 64512  }
  0x17   : > { %3239 = vmatpush3.bf16.msra.mxu0 (!%p490_p9), %v3238_v9  ;;  %v3241_v16 = vpack.c.bf16 (!%p490_p9), %v579_v15, %v578_v14  ;;  %v663_v18 = vld [vmem:[%s4066_s5 + $0x18] sm:$0xff] (!%p490_p9)  ;;  %v742_v28 = vld [vmem:[%s4068_s7 + $0x8] sm:$0xff] (!%p490_p9)  ;;  %v743_v33 = vld [vmem:[%s4068_s7 + $0x10] sm:$0xff] (!%p490_p9)  ;;  %vm2661_vm3 = vcmask (!%p490_p9), 523264   ;;  %s2914_s0 = sshll.u32 (!%p490_p9), %s3570_s28, 7 }
  0x18   : > { %3245 = vmatpush3.bf16.msra.mxu1 (!%p490_p9), %v3244_v13  ;;  %3240 = vmatprep.subr.bf16.mxu0 (!%p490_p9), %v3455_v12  ;;  %v3247_v19 = vpack.c.bf16 (!%p490_p9), %v663_v18, %v662_v17  ;;  %v3250_v31 = vpack.c.bf16 (!%p490_p9), %v742_v28, %v741_v27  ;;  %v744_v34 = vld [vmem:[%s4068_s7 + $0x18] sm:$0xff] (!%p490_p9)  ;;  %v2820_v36 = vld [vmem:[%s4067_s6] ss:$0 sm:$0xff] (!%p490_p9)  ;;  %v2828_v40 = vld [vmem:[%s4064_s3 + $0x28] sm:$0xff] (!%p490_p9) }
  0x19   : > { %3246 = vmatprep.subr.bf16.mxu1 (!%p490_p9), %v3455_v12  ;;  %v3253_v35 = vpack.c.bf16 (!%p490_p9), %v744_v34, %v743_v33  ;;  %v2827_v39 = vld [vmem:[%s4064_s3 + $0x20] sm:$0xff] (!%p490_p9)  ;;  %v2829_v47 = vld [vmem:[%s4064_s3 + $0x30] sm:$0xff] (!%p490_p9)  ;;  %v2830_v48 = vld [vmem:[%s4064_s3 + $0x38] sm:$0xff] (!%p490_p9) }
  0x1a   : > { %v2818_v41 = vld [vmem:[%s4065_s4] ss:$0 sm:$0xff] (!%p490_p9)  ;;  %v3256_v45 = vpack.c.bf16 (!%p490_p9), %v2828_v40, %v2827_v39  ;;  %v3259_v50 = vpack.c.bf16 (!%p490_p9), %v2830_v48, %v2829_v47  ;;  %v2842_v53 = vld [vmem:[%s4068_s7 + $0x28] sm:$0xff] (!%p490_p9)  ;;  %v2843_v57 = vld [vmem:[%s4068_s7 + $0x30] sm:$0xff] (!%p490_p9) }
  0x1b   : > { %3242 = vmatpush3.bf16.msra.mxu0 (!%p490_p9), %v3241_v16  ;;  %v2822_v49 = vld [vmem:[%s4069_s8] ss:$0 sm:$0xff] (!%p490_p9)  ;;  %v2844_v58 = vld [vmem:[%s4068_s7 + $0x38] sm:$0xff] (!%p490_p9)  ;;  %v2835_v13 = vld [vmem:[%s4066_s5 + $0x28] sm:$0xff] (!%p490_p9) }
  0x1c   : > { %s541_s21 = scalar_select %p540_p10, %s3570_s28, 1  ;;  %3248 = vmatpush3.bf16.msra.mxu1 %v3247_v19  ;;  %3249 = vmatprep.subr.bf16.mxu0 %v3455_v12  ;;  %v2816_v25 = vld [vmem:[%s4093_s23] ss:$0 sm:$0xff]  ;;  %v3271_v59 = vpack.c.bf16 %v2844_v58, %v2843_v57  ;;  %v2836_v17 = vld [vmem:[%s4066_s5 + $0x30] sm:$0xff]  ;;  %v2837_v18 = vld [vmem:[%s4066_s5 + $0x38] sm:$0xff] }
  0x1d   : > { %3053 = vmatprep.subr.mxu1 %v3457_v20  ;;  %v2817_v29 = vld [vmem:[%s4094_s2] ss:$0 sm:$0xff]  ;;  %v3265_v19 = vpack.c.bf16 %v2837_v18, %v2836_v17  ;;  %v2846_v28 = vld [vmem:[%s4069_s8 + $0x1] ss:$0 sm:$0xff]  ;;  %v2862_v47 = vld [vmem:[%s4066_s5 + $0x48] sm:$0xff] }
  0x1e   : > { %s2815_s22 = sshll.u32 %s541_s21, 3  ;;  %v2841_v52 = vld [vmem:[%s4068_s7 + $0x20] sm:$0xff] }
  0x1f   : > { %s543_s18 = scalar_lea.vmem %s4092_s30, %s2815_s22  ;;  %v3268_v56 = vpack.c.bf16 %v2842_v53, %v2841_v52  ;;  %v2834_v11 = vld [vmem:[%s4066_s5 + $0x20] sm:$0xff]  ;;  %v2855_v53 = vld [vmem:[%s4064_s3 + $0x48] sm:$0xff]  ;;  %s4018_s30 = scalar_lea.hbm %s4078_s17, %s2914_s0 }
  0x20   : > { %v3602_v0 = vld [vmem:[%s543_s18] sm:$0xff]  ;;  %v3262_v15 = vpack.c.bf16 %v2835_v13, %v2834_v11  ;;  %s537_s18 = sand.u32 1, %s3445_s25  }
  0x21   : > { %v548_v1 = vsel %vm547_vm0, %v3602_v0, 0.0  ;;  %v2854_v52 = vld [vmem:[%s4064_s3 + $0x40] sm:$0xff]  ;;  %s2814_s19 = sshll.u32 %s537_s18, 3  ;;  %s2738_s21 = scalar_lea.sflag [#allocation3], %s537_s18 }
  0x22   : > { %549 = vadd.xlane.f32.xlu0 %v548_v1  ;;  %v2859_v13 = vld [vmem:[%s4065_s4 + $0x2] ss:$0 sm:$0xff]  ;;  %s539_s20 = scalar_lea.vmem [#allocation2], %s2814_s19  ;;  %s3458_s19 = smov [#allocation2]  }
  0x23   : > { %v2873_v17 = vld [vmem:[%s4069_s8 + $0x2] ss:$0 sm:$0xff]  ;;  %s2751_s22 = sshll.u32 %s539_s20, 4  ;;  %s3395_s23 = sshll.u32 %s3458_s19, 4  ;;  %s4020_s22 = int_to_ptr.vmem [resolvable:$true] %s2751_s22  ;;  %s3396_s23 = int_to_ptr.vmem [resolvable:$false] %s3395_s23 }
  0x24   : > { %s3391_s28 = scalar_lea.vmem %s4020_s22, 128  ;;  %s3397_s2 = scalar_lea.vmem %s3396_s23, 256 }
  0x25   : > { %p3392_p11 = scmp.ne.s32.totalorder %s4020_s22, %s3391_s28  ;;  %p3398_p0 = scmp.lt.s32.totalorder %s4020_s22, %s3396_s23 }
  0x26   : > { %p3399_p1 = scmp.lt.s32.totalorder %s3397_s2, %s3391_s28 }
  0x27   : > { %p3393_p12 = pnand %p3392_p11, %p3587_p5 }
  0x28   : > { %p3400_p2 = por %p3399_p1, %p3398_p0 }
  0x29   : > { %p3394_p13 = pneg %p3393_p12 }
  0x2b   : > { %p3401_p3 = pnand %p3400_p2, %p3394_p13 }
  0xaf   : > { %v550_v2 = vpop.xlane.xlu0 %549 }
  0xb0   : > { %v552_v3 = vmul.f32 0.03125, %v550_v2 }
  0xb2   : > { %v553_v4 = vsub.f32 %v3602_v0, %v552_v3 }
  0xb4   : > { %v554_v5 = vmul.f32 %v553_v4, %v553_v4 }
  0xb6   : > { %v555_v6 = vsel %vm547_vm0, %v554_v5, 0.0 }
  0xb7   : > { %556 = vadd.xlane.f32.xlu0 %v555_v6 }
 0x144   : > { %v557_v21 = vpop.xlane.xlu0 %556 }
 0x145   : > { %v558_v22 = vmul.f32 0.03125, %v557_v21 }
 0x147   : > { %v559_v23 = vadd.f32 1e-05, %v558_v22 }
 0x149   : > { %3369 = vrsqrt.f32 %v559_v23  ;;  %v2839_v23 = vld [vmem:[%s4067_s6 + $0x1] ss:$0 sm:$0xff] }
 0x153   : > { %v3370_v24 = vpop.eup %3369 }
 0x154   : > { %v561_v26 = vmul.f32 %v3370_v24, %v553_v4 }
 0x156   : > { %v568_v30 = vmul.f32 %v2816_v25, %v561_v26  ;;  %v2832_v25 = vld [vmem:[%s4065_s4 + $0x1] ss:$0 sm:$0xff] }
 0x158   : > { %v3654_v32 = vadd.f32 %v2817_v29, %v568_v30 }
 0x15a   : > { %3024 = vmatmul.mubr.msk.f32.vlgmr.msra.gmra.mrb[0].mxu0 %vm547_vm0, %v3654_v32  ;;  %3035 = vmatmul.mubr.msk.f32.vlgmr.msra.gmra.mrb[0].mxu1 %vm547_vm0, %v3654_v32 }
 0x15b   : > { %3251 = vmatpush3.bf16.msra.mxu0 %v3250_v31  ;;  %3045 = vmatprep.mubr.msk.f32.mxu0 %vm3456_vm1, %v3457_v20 }
 0x15c   : > { %3252 = vmatprep.subr.bf16.mxu0 %v3455_v12  ;;  %3055 = vmatprep.mubr.msk.f32.mxu1 %vm3456_vm1, %v3457_v20 }
 0x15f   : > { %3254 = vmatpush3.bf16.msra.mxu0 %v3253_v35 }
 0x160   : > { %3048 = vmatprep.subr.mxu0 %v3457_v20 }
 0x162   : > { %3046 = vmatmul.mubr.msk.f32.vlgmr.msra.gmra.mrb[2].mxu0 %vm547_vm0, %v3654_v32 }
 0x163   : > { %3050 = vmatprep.mubr.msk.f32.mxu0 %vm3456_vm1, %v3457_v20 }
 0x22d   : > { %v656_v37 = vpop.f32.mrb[0].mxu0  ;;  %v737_v38 = vpop.f32.mrb[0].mxu1 }
 0x22e   : > { %v738_v42 = vadd.f32 %v2820_v36, %v737_v38  ;;  %v3025_v43 = vpop.f32.mrb[1].mxu0  ;;  %v3036_v44 = vpop.f32.mrb[1].mxu1  ;;  %v657_v46 = vadd.f32 %v2818_v41, %v656_v37  ;;  %v2851_v41 = vld [vmem:[%s4070_s9 + $0x8] sm:$0xff] }
 0x230   : > { %3049 = vmatpush3.xpose.msk.msra.mxu0 %vm822_vm2, %v738_v42 }
 0x231   : > { %3255 = vmatprep.subr.bf16.mxu0 %v3455_v12 }
 0x233   : > { %3051 = vmatmul.mubr.msk.f32.vlgmr.msra.gmra.mrb[4].mxu0 %vm822_vm2, %v657_v46  ;;  %v2861_v46 = vld [vmem:[%s4066_s5 + $0x40] sm:$0xff] }
 0x234   : > { %3257 = vmatpush3.bf16.msra.mxu0 %v3256_v45  ;;  %3066 = vmatprep.mubr.msk.f32.mxu0 %vm3456_vm1, %v3457_v20  ;;  %v984_v45 = vld [vmem:[%s4070_s9] sm:$0xff]  ;;  %v3280_v48 = vpack.c.bf16 %v2862_v47, %v2861_v46  ;;  %v2897_v46 = vld [vmem:[%s4068_s7 + $0x78] sm:$0xff] }
 0x235   : > { %v818_v51 = vpop.f32.mrb[2].mxu0  ;;  %3258 = vmatprep.subr.bf16.mxu0 %v3455_v12 }
 0x236   : > { %v819_v54 = vadd.f32 %v2822_v49, %v818_v51  ;;  %v3047_v55 = vpop.f32.mrb[3].mxu0  ;;  %v2863_v49 = vld [vmem:[%s4066_s5 + $0x50] sm:$0xff] }
 0x237   : > { %v2856_v55 = vld [vmem:[%s4064_s3 + $0x50] sm:$0xff] }
 0x238   : > { %3054 = vmatpush3.msra.mxu1 %v819_v54  ;;  %3260 = vmatpush3.bf16.msra.mxu0 %v3259_v50  ;;  %v2864_v50 = vld [vmem:[%s4066_s5 + $0x58] sm:$0xff]  ;;  %v3274_v54 = vpack.c.bf16 %v2855_v53, %v2854_v52 }
 0x239   : > { %3267 = vmatprep.subr.bf16.mxu0 %v3455_v12  ;;  %3261 = vmatprep.subr.bf16.mxu1 %v3455_v12  ;;  %v3283_v51 = vpack.c.bf16 %v2864_v50, %v2863_v49  ;;  %v2888_v49 = vld [vmem:[%s4066_s5 + $0x68] sm:$0xff]  ;;  %v2890_v52 = vld [vmem:[%s4066_s5 + $0x78] sm:$0xff] }
 0x23b   : > { %3067 = vmatmul.mubr.msk.f32.vlgmr.msra.gmra.mrb[6].mxu0 %vm547_vm0, %v3654_v32 }
 0x23c   : > { %3269 = vmatpush3.bf16.msra.mxu0 %v3268_v56  ;;  %3088 = vmatprep.mubr.msk.f32.mxu0 %vm3456_vm1, %v3457_v20  ;;  %v2857_v56 = vld [vmem:[%s4064_s3 + $0x58] sm:$0xff] }
 0x23d   : > { %3270 = vmatprep.subr.bf16.mxu0 %v3455_v12 }
 0x240   : > { %3272 = vmatpush3.bf16.msra.mxu0 %v3271_v59  ;;  %v3277_v59 = vpack.c.bf16 %v2857_v56, %v2856_v55 }
 0x241   : > { %3101 = vmatprep.subr.mxu0 %v3457_v20 }
 0x243   : > { %3089 = vmatmul.mubr.msk.f32.vlgmr.msra.gmra.mrb[8].mxu0 %vm547_vm0, %v3654_v32 }
 0x244   : > { %3103 = vmatprep.mubr.msk.f32.mxu0 %vm3456_vm1, %v3457_v20  ;;  %3102 = vmatpush3.msra.mxu0 %v2851_v41 }
 0x245   : > { %3273 = vmatprep.subr.bf16.mxu0 %v3455_v12 }
 0x306   : > { %v895_v60 = vpop.f32.mrb[4].mxu0 }
 0x307   : > { %v899_v61 = vmul.f32 0.35355338, %v895_v60  ;;  %v3052_v62 = vpop.f32.mrb[5].mxu0  ;;  %v2868_v60 = vld [vmem:[%s4068_s7 + $0x40] sm:$0xff] }
 0x309   : > { %v900_v63 = vsel %vm822_vm2, %v899_v61, -inf }
 0x30a   : > { %901 = vmax.xlane.f32.xlu1 %v900_v63 }
 0x30e   : > { %v1064_v1 = vpop.f32.mrb[6].mxu0 }
 0x30f   : > { %v3068_v2 = vpop.f32.mrb[7].mxu0  ;;  %v1065_v29 = vadd.f32 %v2832_v25, %v1064_v1 }
 0x310   : > { %v2870_v2 = vld [vmem:[%s4068_s7 + $0x50] sm:$0xff] }
 0x316   : > { %v1230_v3 = vpop.f32.mrb[8].mxu0 }
 0x317   : > { %v3090_v4 = vpop.f32.mrb[9].mxu0  ;;  %v1231_v30 = vadd.f32 %v2846_v28, %v1230_v3  ;;  %v2871_v3 = vld [vmem:[%s4068_s7 + $0x58] sm:$0xff] }
 0x318   : > { %v2866_v4 = vld [vmem:[%s4067_s6 + $0x2] ss:$0 sm:$0xff] }
 0x397   : > { %v902_v5 = vpop.xlane.xlu1 %901 }
 0x398   : > { %v903_v6 = vsub.f32 %v899_v61, %v902_v5  ;;  %v2869_v61 = vld [vmem:[%s4068_s7 + $0x48] sm:$0xff]  ;;  %v3289_v5 = vpack.c.bf16 %v2871_v3, %v2870_v2  ;;  %v2885_v2 = vld [vmem:[%s4065_s4 + $0x3] ss:$0 sm:$0xff] }
 0x399   : > { %v3286_v1 = vpack.c.bf16 %v2869_v61, %v2868_v60 }
 0x39a   : > { %v904_v7 = vmul.f32 1.442695, %v903_v6 }
 0x39c   : > { %3371 = vpow2.f32 %v904_v7 }
 0x3a6   : > { %v3372_v8 = vpop.eup %3371 }
 0x3a7   : > { %v906_v9 = vsel %vm822_vm2, %v3372_v8, 0.0 }
 0x3a8   : > { %907 = vadd.xlane.f32.xlu1 %v906_v9 }
 0x435   : > { %v908_v10 = vpop.xlane.xlu1 %907 }
 0x436   : > { %3373 = vrcp.f32 %v908_v10 }
 0x440   : > { %v3374_v14 = vpop.eup %3373 }
 0x441   : > { %v910_v16 = vmul.f32 %v3374_v14, %v3372_v8 }
 0x443   : > { %3056 = vmatmul.mubr.msk.f32.vlgmr.msra.gmra.mrb[2].mxu1 %vm822_vm2, %v910_v16 }
 0x444   : > { %3263 = vmatpush3.bf16.msra.mxu1 %v3262_v15  ;;  %3077 = vmatprep.mubr.msk.f32.mxu1 %vm3456_vm1, %v3457_v20 }
 0x445   : > { %3264 = vmatprep.subr.bf16.mxu1 %v3455_v12 }
 0x448   : > { %3266 = vmatpush3.bf16.msra.mxu1 %v3265_v19 }
 0x449   : > { %3091 = vmatprep.subr.mxu1 %v3457_v20 }
 0x44b   : > { %3078 = vmatmul.mubr.msk.f32.vlgmr.msra.gmra.mrb[4].mxu1 %vm547_vm0, %v3654_v32 }
 0x44c   : > { %3093 = vmatprep.mubr.msk.f32.mxu1 %vm3456_vm1, %v3457_v20 }
 0x516   : > { %v980_v21 = vpop.f32.mrb[2].mxu1 }
 0x517   : > { %v3057_v22 = vpop.f32.mrb[3].mxu1 }
 0x51e   : > { %v1147_v24 = vpop.f32.mrb[4].mxu1 }
 0x51f   : > { %v1148_v26 = vadd.f32 %v2839_v23, %v1147_v24  ;;  %v3079_v27 = vpop.f32.mrb[5].mxu1 }
 0x521   : > { %3092 = vmatpush3.xpose.msk.msra.mxu1 %vm822_vm2, %v1148_v26 }
 0x522   : > { %3096 = vmatprep.subr.mxu1 %v3457_v20 }
 0x524   : > { %3094 = vmatmul.mubr.msk.f32.vlgmr.msra.gmra.mrb[6].mxu1 %vm822_vm2, %v1065_v29 }
 0x525   : > { %3097 = vmatpush3.msra.mxu1 %v1231_v30  ;;  %3098 = vmatprep.mubr.msk.f32.mxu1 %vm3456_vm1, %v3457_v20 }
 0x526   : > { %3106 = vmatprep.subr.mxu1 %v3457_v20 }
 0x5f7   : > { %v1306_v31 = vpop.f32.mrb[6].mxu1 }
 0x5f8   : > { %v1310_v33 = vmul.f32 0.35355338, %v1306_v31  ;;  %v3095_v34 = vpop.f32.mrb[7].mxu1  ;;  %v2878_v31 = vld [vmem:[%s4070_s9 + $0x10] sm:$0xff] }
 0x5f9   : > { %v2880_v34 = vld [vmem:[%s4064_s3 + $0x60] sm:$0xff] }
 0x5fa   : > { %v1311_v35 = vsel %vm822_vm2, %v1310_v33, -inf }
 0x5fb   : > { %1312 = vmax.xlane.f32.xlu0 %v1311_v35  ;;  %v2881_v35 = vld [vmem:[%s4064_s3 + $0x68] sm:$0xff] }
 0x688   : > { %v1313_v36 = vpop.xlane.xlu0 %1312 }
 0x689   : > { %v1314_v37 = vsub.f32 %v1310_v33, %v1313_v36 }
 0x68b   : > { %v1315_v38 = vmul.f32 1.442695, %v1314_v37  ;;  %v3292_v37 = vpack.c.bf16 %v2881_v35, %v2880_v34 }
 0x68d   : > { %3375 = vpow2.f32 %v1315_v38 }
 0x697   : > { %v3376_v39 = vpop.eup %3375 }
 0x698   : > { %v1317_v40 = vsel %vm822_vm2, %v3376_v39, 0.0 }
 0x699   : > { %1318 = vadd.xlane.f32.xlu1 %v1317_v40  ;;  %v2883_v40 = vld [vmem:[%s4064_s3 + $0x78] sm:$0xff] }
 0x726   : > { %v1319_v42 = vpop.xlane.xlu1 %1318 }
 0x727   : > { %3377 = vrcp.f32 %v1319_v42  ;;  %v2894_v42 = vld [vmem:[%s4068_s7 + $0x60] sm:$0xff] }
 0x731   : > { %v3378_v43 = vpop.eup %3377 }
 0x732   : > { %v1321_v44 = vmul.f32 %v3378_v43, %v3376_v39  ;;  %v2882_v39 = vld [vmem:[%s4064_s3 + $0x70] sm:$0xff]  ;;  %v2895_v43 = vld [vmem:[%s4068_s7 + $0x68] sm:$0xff] }
 0x733   : > { %v3295_v41 = vpack.c.bf16 %v2883_v40, %v2882_v39  ;;  %v2556_v39 = vld [vmem:[%s4074_s13 + $0x18] sm:$0xff] }
 0x734   : > { %3099 = vmatmul.mubr.msk.f32.vlgmr.msra.gmra.mrb[8].mxu1 %vm822_vm2, %v1321_v44  ;;  %v3304_v44 = vpack.c.bf16 %v2895_v43, %v2894_v42 }
 0x735   : > { %3107 = vmatpush3.msra.mxu1 %v984_v45  ;;  %3108 = vmatprep.mubr.msk.f32.mxu1 %vm3456_vm1, %v3457_v20  ;;  %v2896_v45 = vld [vmem:[%s4068_s7 + $0x70] sm:$0xff] }
 0x736   : > { %3279 = vmatprep.subr.bf16.mxu1 %v3455_v12  ;;  %v3307_v47 = vpack.c.bf16 %v2897_v46, %v2896_v45  ;;  %v2907_v45 = vld [vmem:[%s4072_s11] ss:$0 sm:$0xff] }
 0x738   : > { %3109 = vmatmul.mubr.msk.f32.vlgmr.msra.gmra.mrb[10].mxu1 %vm822_vm2, %v980_v21 }
 0x739   : > { %3281 = vmatpush3.bf16.msra.mxu1 %v3280_v48  ;;  %3130 = vmatprep.mubr.msk.f32.mxu1 %vm3456_vm1, %v3457_v20  ;;  %v2887_v48 = vld [vmem:[%s4066_s5 + $0x60] sm:$0xff] }
 0x73a   : > { %3282 = vmatprep.subr.bf16.mxu1 %v3455_v12  ;;  %v3298_v50 = vpack.c.bf16 %v2888_v49, %v2887_v48 }
 0x73d   : > { %3284 = vmatpush3.bf16.msra.mxu1 %v3283_v51  ;;  %v2889_v51 = vld [vmem:[%s4066_s5 + $0x70] sm:$0xff] }
 0x73e   : > { %3144 = vmatprep.subr.mxu1 %v3457_v20  ;;  %v3301_v55 = vpack.c.bf16 %v2890_v52, %v2889_v51  ;;  %v2647_v51 = vld [vmem:[%s4076_s15 + $0x8] sm:$0xff] }
 0x740   : > { %3131 = vmatmul.mubr.msk.f32.vlgmr.msra.gmra.mrb[12].mxu1 %vm547_vm0, %v3654_v32 }
 0x741   : > { %3146 = vmatprep.mubr.msk.f32.mxu1 %vm3456_vm1, %v3457_v20 }
 0x807   : > { %v1391_v57 = vpop.f32.mrb[8].mxu1 }
 0x808   : > { %v3100_v58 = vpop.f32.mrb[9].mxu1  ;;  %3104 = vmatmul.mubr.msk.f32.vlgmr.msra.gmra.mrb[10].mxu0 %vm822_vm2, %v1391_v57 }
 0x809   : > { %3275 = vmatpush3.bf16.msra.mxu0 %v3274_v54  ;;  %3119 = vmatprep.mubr.msk.f32.mxu0 %vm3456_vm1, %v3457_v20 }
 0x80a   : > { %3276 = vmatprep.subr.bf16.mxu0 %v3455_v12 }
 0x80b   : > { %v1539_v62 = vpop.f32.mrb[10].mxu1 }
 0x80c   : > { %v3110_v63 = vpop.f32.mrb[11].mxu1 }
 0x80d   : > { %3278 = vmatpush3.bf16.msra.mxu0 %v3277_v59  ;;  %v2892_v63 = vld [vmem:[%s4067_s6 + $0x3] ss:$0 sm:$0xff] }
 0x80e   : > { %3285 = vmatprep.subr.bf16.mxu0 %v3455_v12 }
 0x810   : > { %3120 = vmatmul.mubr.msk.f32.vlgmr.msra.gmra.mrb[12].mxu0 %vm547_vm0, %v3654_v32 }
 0x811   : > { %3287 = vmatpush3.bf16.msra.mxu0 %v3286_v1  ;;  %3141 = vmatprep.mubr.msk.f32.mxu0 %vm3456_vm1, %v3457_v20 }
 0x812   : > { %3288 = vmatprep.subr.bf16.mxu0 %v3455_v12 }
 0x813   : > { %v1705_v6 = vpop.f32.mrb[12].mxu1 }
 0x814   : > { %v1706_v7 = vadd.f32 %v2866_v4, %v1705_v6  ;;  %v3132_v8 = vpop.f32.mrb[13].mxu1  ;;  %v2899_v4 = vld [vmem:[%s4069_s8 + $0x3] ss:$0 sm:$0xff] }
 0x815   : > { %3290 = vmatpush3.bf16.msra.mxu0 %v3289_v5 }
 0x816   : > { %3145 = vmatpush3.xpose.msk.msra.mxu1 %vm822_vm2, %v1706_v7  ;;  %3154 = vmatprep.subr.mxu0 %v3457_v20 }
 0x817   : > { %3149 = vmatprep.subr.mxu1 %v3457_v20 }
 0x818   : > { %3142 = vmatmul.mubr.msk.f32.vlgmr.msra.gmra.mrb[14].mxu0 %vm547_vm0, %v3654_v32 }
 0x819   : > { %3156 = vmatprep.mubr.msk.f32.mxu0 %vm3456_vm1, %v3457_v20  ;;  %3155 = vmatpush3.msra.mxu0 %v2878_v31 }
 0x81a   : > { %3297 = vmatprep.subr.bf16.mxu0 %v3455_v12 }
 0x8db   : > { %v1466_v9 = vpop.f32.mrb[10].mxu0 }
 0x8dc   : > { %v3843_v10 = vadd.f32 %v1539_v62, %v1466_v9  ;;  %v3105_v11 = vpop.f32.mrb[11].mxu0 }
 0x8e3   : > { %v1622_v14 = vpop.f32.mrb[12].mxu0 }
 0x8e4   : > { %v1623_v15 = vadd.f32 %v2859_v13, %v1622_v14  ;;  %v3121_v16 = vpop.f32.mrb[13].mxu0 }
 0x8e6   : > { %3147 = vmatmul.mubr.msk.f32.vlgmr.msra.gmra.mrb[14].mxu1 %vm822_vm2, %v1623_v15 }
 0x8e7   : > { %3151 = vmatprep.mubr.msk.f32.mxu1 %vm3456_vm1, %v3457_v20 }
 0x8eb   : > { %v1788_v18 = vpop.f32.mrb[14].mxu0 }
 0x8ec   : > { %v1789_v19 = vadd.f32 %v2873_v17, %v1788_v18  ;;  %v3143_v21 = vpop.f32.mrb[15].mxu0  ;;  %v2904_v17 = vld [vmem:[%s4070_s9 + $0x18] sm:$0xff] }
 0x8ee   : > { %3150 = vmatpush3.msra.mxu1 %v1789_v19 }
 0x8ef   : > { %3291 = vmatprep.subr.bf16.mxu1 %v3455_v12 }
 0x9b9   : > { %v1864_v22 = vpop.f32.mrb[14].mxu1 }
 0x9ba   : > { %v1868_v23 = vmul.f32 0.35355338, %v1864_v22  ;;  %v3148_v24 = vpop.f32.mrb[15].mxu1 }
 0x9bc   : > { %v1869_v25 = vsel %vm822_vm2, %v1868_v23, -inf }
 0x9bd   : > { %1870 = vmax.xlane.f32.xlu0 %v1869_v25 }
 0xa4a   : > { %v1871_v26 = vpop.xlane.xlu0 %1870 }
 0xa4b   : > { %v1872_v27 = vsub.f32 %v1868_v23, %v1871_v26 }
 0xa4d   : > { %v1873_v28 = vmul.f32 1.442695, %v1872_v27  ;;  %v2906_v27 = vld [vmem:[%s4071_s10] ss:$0 sm:$0xff] }
 0xa4f   : > { %3379 = vpow2.f32 %v1873_v28 }
 0xa59   : > { %v3380_v29 = vpop.eup %3379 }
 0xa5a   : > { %v1875_v30 = vsel %vm822_vm2, %v3380_v29, 0.0 }
 0xa5b   : > { %1876 = vadd.xlane.f32.xlu1 %v1875_v30 }
 0xae8   : > { %v1877_v33 = vpop.xlane.xlu1 %1876 }
 0xae9   : > { %3381 = vrcp.f32 %v1877_v33 }
 0xaf3   : > { %v3382_v36 = vpop.eup %3381 }
 0xaf4   : > { %v1879_v38 = vmul.f32 %v3382_v36, %v3380_v29  ;;  %v2553_v36 = vld [vmem:[%s4074_s13] sm:$0xff] }
 0xaf6   : > { %3152 = vmatmul.mubr.msk.f32.vlgmr.msra.gmra.mrb[16].mxu1 %vm822_vm2, %v1879_v38  ;;  %v2555_v38 = vld [vmem:[%s4074_s13 + $0x10] sm:$0xff] }
 0xaf7   : > { %3293 = vmatpush3.bf16.msra.mxu1 %v3292_v37  ;;  %3167 = vmatprep.mubr.msk.f32.mxu1 %vm3456_vm1, %v3457_v20  ;;  %v3313_v40 = vpack.c.bf16 %v2556_v39, %v2555_v38 }
 0xaf8   : > { %3294 = vmatprep.subr.bf16.mxu1 %v3455_v12 }
 0xafb   : > { %3296 = vmatpush3.bf16.msra.mxu1 %v3295_v41 }
 0xafc   : > { %3303 = vmatprep.subr.bf16.mxu1 %v3455_v12 }
 0xafe   : > { %3168 = vmatmul.mubr.msk.f32.vlgmr.msra.gmra.mrb[18].mxu1 %vm547_vm0, %v3654_v32 }
 0xaff   : > { %3305 = vmatpush3.bf16.msra.mxu1 %v3304_v44  ;;  %3189 = vmatprep.mubr.msk.f32.mxu1 %vm3456_vm1, %v3457_v20 }
 0xb00   : > { %3306 = vmatprep.subr.bf16.mxu1 %v3455_v12 }
 0xb03   : > { %3308 = vmatpush3.bf16.msra.mxu1 %v3307_v47  ;;  %v2908_v47 = vld [vmem:[%s4073_s12] ss:$0 sm:$0xff] }
 0xb04   : > { %3202 = vmatprep.subr.mxu1 %v3457_v20 }
 0xb06   : > { %3190 = vmatmul.mubr.msk.f32.vlgmr.msra.gmra.mrb[20].mxu1 %vm547_vm0, %v3654_v32 }
 0xb07   : > { %3204 = vmatprep.mubr.msk.f32.mxu1 %vm3456_vm1, %v3457_v20  ;;  %3203 = vmatpush3.msra.mxu1 %v2904_v17 }
 0xb08   : > { %3315 = vmatprep.subr.bf16.mxu1 %v3455_v12 }
 0xbc9   : > { %v1949_v53 = vpop.f32.mrb[16].mxu1 }
 0xbca   : > { %v3153_v54 = vpop.f32.mrb[17].mxu1  ;;  %3157 = vmatmul.mubr.msk.f32.vlgmr.msra.gmra.mrb[16].mxu0 %vm822_vm2, %v1949_v53  ;;  %v2648_v53 = vld [vmem:[%s4076_s15 + $0x10] sm:$0xff] }
 0xbcb   : > { %3299 = vmatpush3.bf16.msra.mxu0 %v3298_v50  ;;  %3178 = vmatprep.mubr.msk.f32.mxu0 %vm3456_vm1, %v3457_v20  ;;  %v2646_v50 = vld [vmem:[%s4076_s15] sm:$0xff]  ;;  %v2649_v54 = vld [vmem:[%s4076_s15 + $0x18] sm:$0xff] }
 0xbcc   : > { %3300 = vmatprep.subr.bf16.mxu0 %v3455_v12  ;;  %v3316_v52 = vpack.c.bf16 %v2647_v51, %v2646_v50 }
 0xbcf   : > { %3302 = vmatpush3.bf16.msra.mxu0 %v3301_v55  ;;  %v3319_v55 = vpack.c.bf16 %v2649_v54, %v2648_v53 }
 0xbd0   : > { %3192 = vmatprep.subr.mxu0 %v3457_v20 }
 0xbd1   : > { %v2108_v56 = vpop.f32.mrb[18].mxu1 }
 0xbd2   : > { %v3169_v57 = vpop.f32.mrb[19].mxu1  ;;  %3179 = vmatmul.mubr.msk.f32.vlgmr.msra.gmra.mrb[18].mxu0 %vm547_vm0, %v3654_v32  ;;  %v2109_v5 = vadd.f32 %v2885_v2, %v2108_v56  ;;  %v2650_v56 = vld [vmem:[%s4076_s15 + $0x20] sm:$0xff] }
 0xbd3   : > { %3194 = vmatprep.mubr.msk.f32.mxu0 %vm3456_vm1, %v3457_v20  ;;  %v2651_v57 = vld [vmem:[%s4076_s15 + $0x28] sm:$0xff] }
 0xbd9   : > { %v2274_v58 = vpop.f32.mrb[20].mxu1 }
 0xbda   : > { %v3191_v59 = vpop.f32.mrb[21].mxu1  ;;  %v2275_v6 = vadd.f32 %v2899_v4, %v2274_v58  ;;  %v3322_v58 = vpack.c.bf16 %v2651_v57, %v2650_v56 }
 0xbdb   : > { %v2652_v59 = vld [vmem:[%s4076_s15 + $0x30] sm:$0xff] }
 0xc9d   : > { %v2024_v60 = vpop.f32.mrb[16].mxu0 }
 0xc9e   : > { %v2028_v61 = vadd.f32 %v2024_v60, %v3843_v10  ;;  %v3158_v62 = vpop.f32.mrb[17].mxu0  ;;  %v2653_v60 = vld [vmem:[%s4076_s15 + $0x38] sm:$0xff] }
 0xc9f   : > { %v2909_v62 = vld [vmem:[%s4075_s14] ss:$0 sm:$0xff] }
 0xca5   : > { %v2191_v1 = vpop.f32.mrb[18].mxu0 }
 0xca6   : > { %v2192_v3 = vadd.f32 %v2892_v63, %v2191_v1  ;;  %v3180_v32 = vpop.f32.mrb[19].mxu0 }
 0xca8   : > { %3193 = vmatpush3.xpose.msk.msra.mxu0 %vm822_vm2, %v2192_v3 }
 0xca9   : > { %3197 = vmatprep.subr.mxu0 %v3457_v20 }
 0xcab   : > { %3195 = vmatmul.mubr.msk.f32.vlgmr.msra.gmra.mrb[20].mxu0 %vm822_vm2, %v2109_v5 }
 0xcac   : > { %3198 = vmatpush3.msra.mxu0 %v2275_v6  ;;  %3199 = vmatprep.mubr.msk.f32.mxu0 %vm3456_vm1, %v3457_v20 }
 0xcad   : > { %3309 = vmatprep.subr.bf16.mxu0 %v3455_v12 }
 0xd7e   : > { %v2350_v7 = vpop.f32.mrb[20].mxu0 }
 0xd7f   : > { %v2354_v8 = vmul.f32 0.35355338, %v2350_v7  ;;  %v3196_v9 = vpop.f32.mrb[21].mxu0 }
 0xd81   : > { %v2355_v10 = vsel %vm822_vm2, %v2354_v8, -inf }
 0xd82   : > { %2356 = vmax.xlane.f32.xlu0 %v2355_v10  ;;  %v2911_v10 = vld [vmem:[%s4077_s16] ss:$0 sm:$0xff] }
 0xe0f   : > { %v2357_v11 = vpop.xlane.xlu0 %2356 }
 0xe10   : > { %v2358_v13 = vsub.f32 %v2354_v8, %v2357_v11 }
 0xe12   : > { %v2359_v14 = vmul.f32 1.442695, %v2358_v13 }
 0xe14   : > { %3383 = vpow2.f32 %v2359_v14 }
 0xe1e   : > { %v3384_v15 = vpop.eup %3383 }
 0xe1f   : > { %v2361_v16 = vsel %vm822_vm2, %v3384_v15, 0.0 }
 0xe20   : > { %2362 = vadd.xlane.f32.xlu1 %v2361_v16 }
 0xead   : > { %v2363_v18 = vpop.xlane.xlu1 %2362 }
 0xeae   : > { %3385 = vrcp.f32 %v2363_v18 }
 0xeb8   : > { %v3386_v19 = vpop.eup %3385 }
 0xeb9   : > { %v2365_v21 = vmul.f32 %v3386_v19, %v3384_v15 }
 0xebb   : > { %3200 = vmatmul.mubr.msk.f32.vlgmr.msra.gmra.mrb[22].mxu0 %vm822_vm2, %v2365_v21 }
 0xebc   : > { %3215 = vmatprep.mubr.msk.f32.mxu0 %vm3456_vm1, %v3457_v20 }
 0xf8e   : > { %v2435_v22 = vpop.f32.mrb[22].mxu0 }
 0xf8f   : > { %v3201_v23 = vpop.f32.mrb[23].mxu0  ;;  %3205 = vmatmul.mubr.msk.f32.vlgmr.msra.gmra.mrb[22].mxu1 %vm822_vm2, %v2435_v22 }
 0xf90   : > { %3234 = vmatprep.mubr.msk.f32.mxu1 %vm3456_vm1, %v3457_v20  ;;  %3317 = vmatpush3.bf16.msra.mxu1 %v3316_v52 }
 0xf91   : > { %3318 = vmatprep.subr.bf16.mxu1 %v3455_v12 }
 0xf94   : > { %3320 = vmatpush3.bf16.msra.mxu1 %v3319_v55 }
 0xf95   : > { %3321 = vmatprep.subr.bf16.mxu1 %v3455_v12 }
 0xf98   : > { %3323 = vmatpush3.bf16.msra.mxu1 %v3322_v58 }
 0xf99   : > { %3324 = vmatprep.subr.bf16.mxu1 %v3455_v12 }
0x1062   : > { %v2510_v24 = vpop.f32.mrb[22].mxu1 }
0x1063   : > { %v2514_v25 = vadd.f32 %v2510_v24, %v2028_v61  ;;  %v3206_v26 = vpop.f32.mrb[23].mxu1  ;;  %v3325_v61 = vpack.c.bf16 %v2653_v60, %v2652_v59 }
0x1065   : > { %v2515_v28 = vadd.f32 %v2514_v25, %v3602_v0  ;;  %v2554_v0 = vld [vmem:[%s4074_s13 + $0x8] sm:$0xff]  ;;  %3326 = vmatpush3.bf16.msra.mxu1 %v3325_v61 }
0x1066   : > { %v3310_v37 = vpack.c.bf16 %v2554_v0, %v2553_v36 }
0x1067   : > { %v3953_v29 = vadd.f32 %v2906_v27, %v2515_v28 }
0x1068   : > { %3311 = vmatpush3.bf16.msra.mxu0 %v3310_v37 }
0x1069   : > { %v2526_v30 = vsel %vm547_vm0, %v3953_v29, 0.0  ;;  %3312 = vmatprep.subr.bf16.mxu0 %v3455_v12 }
0x106a   : > { %2527 = vadd.xlane.f32.xlu0 %v2526_v30 }
0x106c   : > { %3314 = vmatpush3.bf16.msra.mxu0 %v3313_v40 }
0x10f7   : > { %v2528_v31 = vpop.xlane.xlu0 %2527 }
0x10f8   : > { %v2529_v33 = vmul.f32 0.03125, %v2528_v31 }
0x10fa   : > { %v2530_v34 = vsub.f32 %v3953_v29, %v2529_v33 }
0x10fc   : > { %v2531_v20 = vmul.f32 %v2530_v34, %v2530_v34 }
0x10fe   : > { %v2532_v35 = vsel %vm547_vm0, %v2531_v20, 0.0 }
0x10ff   : > { %2533 = vadd.xlane.f32.xlu1 %v2532_v35 }
0x118c   : > { %v2534_v41 = vpop.xlane.xlu1 %2533 }
0x118d   : > { %v2535_v42 = vmul.f32 0.03125, %v2534_v41 }
0x118f   : > { %v2536_v43 = vadd.f32 1e-05, %v2535_v42 }
0x1191   : > { %3387 = vrsqrt.f32 %v2536_v43 }
0x119b   : > { %v3388_v44 = vpop.eup %3387 }
0x119c   : > { %v2538_v46 = vmul.f32 %v3388_v44, %v2530_v34 }
0x119e   : > { %v2545_v48 = vmul.f32 %v2907_v45, %v2538_v46 }
0x11a0   : > { %v2552_v49 = vadd.f32 %v2908_v47, %v2545_v48 }
0x11a2   : > { %3216 = vmatmul.mubr.msk.f32.vlgmr.msra.gmra.mrb[24].mxu0 %vm547_vm0, %v2552_v49 }
0x1275   : > { %v2633_v63 = vpop.f32.mrb[24].mxu0 }
0x1276   : > { %v2634_v1 = vadd.f32 %v2909_v62, %v2633_v63  ;;  %v3217_v2 = vpop.f32.mrb[25].mxu0 }
0x1278   : > { %v2638_v3 = vmul.f32 0.044715, %v2634_v1  ;;  %v2637_v8 = vmul.f32 0.5, %v2634_v1 }
0x127a   : > { %v2639_v32 = vmul.f32 %v2638_v3, %v2634_v1 }
0x127c   : > { %v2640_v4 = vmul.f32 %v2639_v32, %v2634_v1 }
0x127e   : > { %v2641_v5 = vadd.f32 %v2640_v4, %v2634_v1 }
0x1280   : > { %v2642_v6 = vmul.f32 0.7978846, %v2641_v5 }
0x1282   : > { %3389 = vtanh.f32 %v2642_v6 }
0x128c   : > { %v3390_v7 = vpop.eup %3389 }
0x128d   : > { %v2644_v9 = vadd.f32 1.0, %v3390_v7 }
0x128f   : > { %v2645_v12 = vmul.f32 %v2644_v9, %v2637_v8 }
0x1291   : > { %3235 = vmatmul.mubr.msk.f32.vlgmr.msra.gmra.mrb[24].mxu1 %vm2661_vm3, %v2645_v12 }
0x1364   : > { %v2731_v11 = vpop.f32.mrb[24].mxu1 }
0x1365   : > { %v2732_v13 = vadd.f32 %v2911_v10, %v2731_v11  ;;  %v3236_v14 = vpop.f32.mrb[25].mxu1 }
0x1367   : > { %v2735_v15 = vadd.f32 %v2732_v13, %v3953_v29 }
0x1369   : > { %2736 = vst.msk [vmem:[%s539_s20] sm:$0xff] %vm547_vm0, %v2735_v15 }
0x136a   : > { %3404 = shalt.err (!%p3401_p3)
}
0x136b   : > { %s3405_s18 = scalar_lea.hbm %s4018_s30, 128  ;;  %s3409_s26 = scalar_lea.hbm %s4078_s17, 256 }
0x136c   : > { %p3406_p4 = scmp.ne.s32.totalorder %s4018_s30, %s3405_s18  ;;  %p3410_p9 = scmp.lt.u32.totalorder %s4018_s30, %s4078_s17 }
0x136d   : > { %p3411_p10 = scmp.lt.u32.totalorder %s3409_s26, %s3405_s18  ;;  %p3413_p12 = scmp.lt.u32.totalorder %s3405_s18, %s4018_s30 }
0x136e   : > { %p3407_p7 = pnand %p3406_p4, %p3587_p5 }
0x136f   : > { %p3412_p11 = por %p3411_p10, %p3410_p9 }
0x1370   : > { %p3408_p8 = pneg %p3407_p7 }
0x1371   : > { %p3414_p13 = por %p3413_p12, %p3412_p11 }
0x1373   : > { %p3415_p0 = pnand %p3414_p13, %p3408_p8 }
0x1375   : > { %3418 = shalt.err (!%p3415_p0)
}
0x1376   : > { %3327 = dma.vmem_to_hbm [thread:$0]  (%p3587_p5), %s4020_s22, 128, %s4018_s30, %s2738_s21  }
0x1377 PF: > { %p3333_p1 = scmp.ge.s32.totalorder %s3453_s27, 2  ;;  %s2763_s28 = sand.u32 1, %s3441_s24  }
0x1378   : > { %s2764_s23 = scalar_lea.sflag [#allocation3], %s2763_s28 }
0x1379   : > { %p3330_p2 = pnand %p3333_p1, %p3591_p6 }
0x137b   : > { %3436 = dma.done.wait (!%p3330_p2), %s2764_s23, 128  }
0x137c   : > { %3438 = vsyncadd (!%p3330_p2), %s2764_s23, 4294967168  ;;  %s4096_s27 = sld [smem:[#allocation6_spill]]  ;;  %s4097_s18 = sld [smem:[#allocation5_spill]] }
0x137d   : > { %s4098_s26 = sld [smem:[#allocation7_spill]]  ;;  %s4099_s24 = smov %s3445_s25 }
0x1382   : > { %p27_p3 = scmp.ge.s32.totalorder %s4096_s27, 4   ;;  %s4100_s25 = smov %s4097_s18 }
0x1384   :  { %29 = sbr.rel (!%p27_p3) target bundleno = 7 (0x7), region = 144 }
0x138b   :  { %2769 = vsyncpa [#allocation3], 1 }
0x138c   :  { %2771 = vsyncpa [#allocation3 + $0x1], 1 }

</bundles_post_ra>
